<compile_context>
chip_gen: v7x
topology: tpu7x:2x2x1
jax: 0.10.0
libtpu: 0.0.40
codegen_flags: <defaults>
</compile_context>

<pallas_src>
import jax
import jax.numpy as jnp
from jax.experimental import pallas as pl
from jax.experimental.pallas import tpu as pltpu

D_IN = 784
D_H = 400
D_H_PAD = 512        # 400 -> 512: clean MXU / vreg tiling, zero-padded
D_Z = 20
D_Z_PAD = 128        # latent padded to one full lane tile
D_STATS = 256        # [mu (pad 128) | logvar (pad 128)]


def vae_kernel(x_ref, eps_ref,
               w1_ref, b1_ref,
               wenc_ref, benc_ref,
               w3_ref, b3_ref,
               w4_ref, b4_ref,
               recon_ref, stats_ref):
    # fc1: bf16 operands, f32 accumulate; bias + ReLU in f32.
    x_bf16 = x_ref[...].astype(jnp.bfloat16)
    h1 = jnp.dot(x_bf16, w1_ref[...], preferred_element_type=jnp.float32)
    h1 = jnp.maximum(h1 + b1_ref[...], 0.0)

    # Fused fc21|fc22 head: bf16 operands, f32 acc. Lanes [0,128)=mu,
    # lanes [128,256)=logvar. Padded lanes are exactly zero (zero weight cols).
    stats = jnp.dot(h1.astype(jnp.bfloat16), wenc_ref[...],
                    preferred_element_type=jnp.float32) + benc_ref[...]
    stats_ref[...] = stats                       # lane-dense 256-wide store

    mu = stats[:, :D_Z_PAD]                      # vreg-aligned slices
    logvar = stats[:, D_Z_PAD:]

    # Reparameterize in f32. Padded lanes: mu=0, logvar=0, eps=0 -> z=0; any
    # non-zero noise in pad lanes would be cancelled by the zero rows of w3.
    z = mu + eps_ref[...] * jnp.exp(0.5 * logvar)

    # fc3: bf16 operands, f32 acc; bias + ReLU in f32. Padded hidden cols -> 0.
    h3 = jnp.dot(z.astype(jnp.bfloat16), w3_ref[...],
                 preferred_element_type=jnp.float32) + b3_ref[...]
    h3 = jnp.maximum(h3, 0.0)

    # fc4: bf16 operands, f32 acc; sigmoid in f32; store recon as bf16.
    logits = jnp.dot(h3.astype(jnp.bfloat16), w4_ref[...],
                     preferred_element_type=jnp.float32) + b4_ref[...]
    recon_ref[...] = jax.nn.sigmoid(logits).astype(recon_ref.dtype)


def init_params(key):
    """Parameters in (in, out) layout, PyTorch-default uniform init."""
    dims = [(D_IN, D_H), (D_H, D_Z), (D_H, D_Z), (D_Z, D_H), (D_H, D_IN)]
    names = ["fc1", "fc21", "fc22", "fc3", "fc4"]
    params = {}
    for name, (din, dout) in zip(names, dims):
        key, kw, kb = jax.random.split(key, 3)
        bound = 1.0 / jnp.sqrt(float(din))
        params[name + "_w"] = jax.random.uniform(
            kw, (din, dout), jnp.float32, minval=-bound, maxval=bound)
        params[name + "_b"] = jax.random.uniform(
            kb, (1, dout), jnp.float32, minval=-bound, maxval=bound)
    return params


def pack_params(params):
    """Pad / fuse / cast parameters into the kernel layout (all weights bf16)."""
    # fc1: pad hidden cols 400 -> 512.
    w1 = jnp.zeros((D_IN, D_H_PAD), jnp.float32).at[:, :D_H].set(params["fc1_w"])
    w1 = w1.astype(jnp.bfloat16)
    b1 = jnp.zeros((1, D_H_PAD), jnp.float32).at[:, :D_H].set(params["fc1_b"])

    # Fused encoder head: [mu | logvar], each padded to 128 lanes; rows padded
    # 400 -> 512 with zeros.
    wenc = jnp.zeros((D_H_PAD, D_STATS), jnp.float32)
    wenc = wenc.at[:D_H, :D_Z].set(params["fc21_w"])
    wenc = wenc.at[:D_H, D_Z_PAD:D_Z_PAD + D_Z].set(params["fc22_w"])
    wenc = wenc.astype(jnp.bfloat16)
    benc = jnp.zeros((1, D_STATS), jnp.float32)
    benc = benc.at[:, :D_Z].set(params["fc21_b"])
    benc = benc.at[:, D_Z_PAD:D_Z_PAD + D_Z].set(params["fc22_b"])

    # fc3: pad latent rows 20 -> 128 and hidden cols 400 -> 512 with zeros.
    w3 = jnp.zeros((D_Z_PAD, D_H_PAD), jnp.float32).at[:D_Z, :D_H].set(
        params["fc3_w"])
    w3 = w3.astype(jnp.bfloat16)
    b3 = jnp.zeros((1, D_H_PAD), jnp.float32).at[:, :D_H].set(params["fc3_b"])

    # fc4: pad hidden rows 400 -> 512; output cols stay an exact 784.
    w4 = jnp.zeros((D_H_PAD, D_IN), jnp.float32).at[:D_H].set(params["fc4_w"])
    w4 = w4.astype(jnp.bfloat16)
    b4 = params["fc4_b"]                          # (1, 784) f32

    return w1, b1, wenc, benc, w3, b3, w4, b4


def _round_up(n, m):
    return ((n + m - 1) // m) * m


def vae_forward(x, eps, params, *, tile_b=512):
    """x: (B, ...) flattened to (B, 784). eps: (B, 20) standard-normal noise.

    Returns (recon[bf16], mu[f32], logvar[f32]) with the module's semantics.
    """
    B = x.shape[0]
    x = x.reshape(B, D_IN).astype(jnp.float32)
    eps = eps.astype(jnp.float32)

    # Batch tiling: never exceed the (rounded) batch; ensure >=2 grid steps
    # when possible so the "parallel" axis shards across both v7x TensorCores.
    tile_b = max(16, min(tile_b, _round_up(B, 16)))
    if B > 16 and _round_up(B, tile_b) // tile_b < 2:
        tile_b = _round_up(-(-B // 2), 16)
    b_pad = _round_up(B, tile_b)

    # x goes in UNPADDED f32 (no 896-wide pad copy); only batch rows are padded
    # when B does not divide the tile.
    if b_pad != B:
        x_in = jnp.zeros((b_pad, D_IN), jnp.float32).at[:B].set(x)
    else:
        x_in = x
    # eps padded to one full lane tile (tiny; zero pad lanes keep z pad = 0).
    eps_in = jnp.zeros((b_pad, D_Z_PAD), jnp.float32).at[:B, :D_Z].set(eps)

    w1, b1, wenc, benc, w3, b3, w4, b4 = pack_params(params)

    grid = (b_pad // tile_b,)

    def batch_spec(ncols):
        return pl.BlockSpec((tile_b, ncols), lambda i: (i, 0))

    def resident_spec(shape):
        # Constant block index -> weights stay VMEM-resident across grid steps.
        return pl.BlockSpec(shape, lambda i: (0, 0))

    recon_pad, stats = pl.pallas_call(
        vae_kernel,
        out_shape=(
            jax.ShapeDtypeStruct((b_pad, D_IN), jnp.bfloat16),   # recon (bf16)
            jax.ShapeDtypeStruct((b_pad, D_STATS), jnp.float32), # [mu|logvar]
        ),
        grid=grid,
        in_specs=[
            batch_spec(D_IN),                    # x (f32, unpadded 784 cols)
            batch_spec(D_Z_PAD),                 # eps
            resident_spec((D_IN, D_H_PAD)),      # w1 (bf16)
            resident_spec((1, D_H_PAD)),         # b1
            resident_spec((D_H_PAD, D_STATS)),   # fused fc21|fc22 weight (bf16)
            resident_spec((1, D_STATS)),         # fused fc21|fc22 bias
            resident_spec((D_Z_PAD, D_H_PAD)),   # w3 (bf16)
            resident_spec((1, D_H_PAD)),         # b3
            resident_spec((D_H_PAD, D_IN)),      # w4 (bf16)
            resident_spec((1, D_IN)),            # b4
        ],
        out_specs=(
            batch_spec(D_IN),                    # recon (784 wide, bf16)
            batch_spec(D_STATS),                 # [mu | logvar] slab (256 wide)
        ),
        compiler_params=pltpu.CompilerParams(
            dimension_semantics=("parallel",),   # megacore split on v7x
            vmem_limit_bytes=48 << 20,           # tile_b<=1024 fits comfortably
        ),
    )(x_in, eps_in, w1, b1, wenc, benc, w3, b3, w4, b4)

    recon = recon_pad[:B] if b_pad != B else recon_pad
    mu = stats[:B, :D_Z]
    logvar = stats[:B, D_Z_PAD:D_Z_PAD + D_Z]
    return recon, mu, logvar


def vae_forward_ref(x, eps, params):
    """Pure-JAX f32 reference (module semantics)."""
    B = x.shape[0]
    x = x.reshape(B, D_IN).astype(jnp.float32)
    h1 = jnp.maximum(x @ params["fc1_w"] + params["fc1_b"], 0.0)
    mu = h1 @ params["fc21_w"] + params["fc21_b"]
    logvar = h1 @ params["fc22_w"] + params["fc22_b"]
    z = mu + eps * jnp.exp(0.5 * logvar)
    h3 = jnp.maximum(z @ params["fc3_w"] + params["fc3_b"], 0.0)
    recon = jax.nn.sigmoid(h3 @ params["fc4_w"] + params["fc4_b"])
    return recon, mu, logvar


if __name__ == "__main__":
    key = jax.random.PRNGKey(0)
    kparam, kx, keps = jax.random.split(key, 3)

    params = init_params(kparam)

    B = 8
    # MNIST-shaped input (B, 1, 28, 28) -> flattened to (B, 784) in the wrapper.
    x = jax.random.uniform(kx, (B, 1, 28, 28), jnp.float32)
    # torch.randn_like(std) replaced by externally supplied standard-normal eps.
    eps = jax.random.normal(keps, (B, D_Z), jnp.float32)

    recon, mu, logvar = jax.block_until_ready(vae_forward(x, eps, params))

    # Sanity-check against pure-JAX f32 reference (tolerance relaxed because
    # all matmuls use bf16 operands with f32 accumulation and recon is bf16).
    r_ref, mu_ref, lv_ref = vae_forward_ref(x, eps, params)
    assert recon.shape == (B, D_IN) and mu.shape == (B, D_Z) and logvar.shape == (B, D_Z)
    assert jnp.allclose(recon.astype(jnp.float32), r_ref, atol=2e-2, rtol=2e-2)
    assert jnp.allclose(mu, mu_ref, atol=2e-2, rtol=2e-2)
    assert jnp.allclose(logvar, lv_ref, atol=2e-2, rtol=2e-2)

    print("KERNEL_OK")
</pallas_src>

<mosaic_0001>
module attributes {stable_mosaic.version = 11 : i64} {
  func.func @vae_kernel(%arg0: i32, %arg1: memref<16x784xf32, #tpu.memory_space<vmem>>, %arg2: memref<16x128xf32, #tpu.memory_space<vmem>>, %arg3: memref<784x512xbf16, #tpu.memory_space<vmem>>, %arg4: memref<1x512xf32, #tpu.memory_space<vmem>>, %arg5: memref<512x256xbf16, #tpu.memory_space<vmem>>, %arg6: memref<1x256xf32, #tpu.memory_space<vmem>>, %arg7: memref<128x512xbf16, #tpu.memory_space<vmem>>, %arg8: memref<1x512xf32, #tpu.memory_space<vmem>>, %arg9: memref<512x784xbf16, #tpu.memory_space<vmem>>, %arg10: memref<1x784xf32, #tpu.memory_space<vmem>>, %arg11: memref<16x784xbf16, #tpu.memory_space<vmem>>, %arg12: memref<16x256xf32, #tpu.memory_space<vmem>>) attributes {dimension_semantics = [#tpu.dimension_semantics<parallel>], iteration_bounds = array<i64: 1>, scalar_prefetch = 0 : i64, scratch_operands = 0 : i64, tpu.core_type = #tpu.core_type<tc>, window_params = [{transform_indices = @transform_0, window_bounds = array<i64: 16, 784>}, {transform_indices = @transform_1, window_bounds = array<i64: 16, 128>}, {pipeline_mode = #tpu.pipeline_mode<synchronous>, transform_indices = @transform_2, window_bounds = array<i64: 784, 512>}, {pipeline_mode = #tpu.pipeline_mode<synchronous>, transform_indices = @transform_3, window_bounds = array<i64: 1, 512>}, {pipeline_mode = #tpu.pipeline_mode<synchronous>, transform_indices = @transform_4, window_bounds = array<i64: 512, 256>}, {pipeline_mode = #tpu.pipeline_mode<synchronous>, transform_indices = @transform_5, window_bounds = array<i64: 1, 256>}, {pipeline_mode = #tpu.pipeline_mode<synchronous>, transform_indices = @transform_6, window_bounds = array<i64: 128, 512>}, {pipeline_mode = #tpu.pipeline_mode<synchronous>, transform_indices = @transform_7, window_bounds = array<i64: 1, 512>}, {pipeline_mode = #tpu.pipeline_mode<synchronous>, transform_indices = @transform_8, window_bounds = array<i64: 512, 784>}, {pipeline_mode = #tpu.pipeline_mode<synchronous>, transform_indices = @transform_9, window_bounds = array<i64: 1, 784>}, {transform_indices = @transform_10, window_bounds = array<i64: 16, 784>}, {transform_indices = @transform_11, window_bounds = array<i64: 16, 256>}]} {
    %c0 = arith.constant 0 : index
    %c0_0 = arith.constant 0 : index
    %0 = vector.load %arg1[%c0, %c0_0] : memref<16x784xf32, #tpu.memory_space<vmem>>, vector<16x784xf32>
    %1 = arith.truncf %0 : vector<16x784xf32> to vector<16x784xbf16>
    %c0_1 = arith.constant 0 : index
    %c0_2 = arith.constant 0 : index
    %2 = vector.load %arg3[%c0_1, %c0_2] : memref<784x512xbf16, #tpu.memory_space<vmem>>, vector<784x512xbf16>
    %cst = arith.constant dense<0.000000e+00> : vector<16x512xf32>
    %3 = tpu.matmul %1, %2, %cst {dimension_numbers = #tpu.dot_dimension_numbers<[1], [0], [0], [1], [0, 0, 1, 1], [], []>} : vector<16x784xbf16>, vector<784x512xbf16>, vector<16x512xf32> -> vector<16x512xf32>
    %c0_3 = arith.constant 0 : index
    %c0_4 = arith.constant 0 : index
    %4 = vector.load %arg4[%c0_3, %c0_4] : memref<1x512xf32, #tpu.memory_space<vmem>>, vector<1x512xf32>
    %5 = vector.broadcast %4 : vector<1x512xf32> to vector<16x512xf32>
    %6 = arith.addf %3, %5 : vector<16x512xf32>
    %cst_5 = arith.constant 0.000000e+00 : f32
    %7 = vector.broadcast %cst_5 : f32 to vector<16x512xf32>
    %8 = arith.maximumf %6, %7 : vector<16x512xf32>
    %9 = arith.truncf %8 : vector<16x512xf32> to vector<16x512xbf16>
    %c0_6 = arith.constant 0 : index
    %c0_7 = arith.constant 0 : index
    %10 = vector.load %arg5[%c0_6, %c0_7] : memref<512x256xbf16, #tpu.memory_space<vmem>>, vector<512x256xbf16>
    %cst_8 = arith.constant dense<0.000000e+00> : vector<16x256xf32>
    %11 = tpu.matmul %9, %10, %cst_8 {dimension_numbers = #tpu.dot_dimension_numbers<[1], [0], [0], [1], [0, 0, 1, 1], [], []>} : vector<16x512xbf16>, vector<512x256xbf16>, vector<16x256xf32> -> vector<16x256xf32>
    %c0_9 = arith.constant 0 : index
    %c0_10 = arith.constant 0 : index
    %12 = vector.load %arg6[%c0_9, %c0_10] : memref<1x256xf32, #tpu.memory_space<vmem>>, vector<1x256xf32>
    %13 = vector.broadcast %12 : vector<1x256xf32> to vector<16x256xf32>
    %14 = arith.addf %11, %13 : vector<16x256xf32>
    %c0_11 = arith.constant 0 : index
    %c0_12 = arith.constant 0 : index
    %15 = vector.load %arg12[%c0_11, %c0_12] : memref<16x256xf32, #tpu.memory_space<vmem>>, vector<16x256xf32>
    tpu.vector_store %arg12[%c0_11, %c0_12], %14 {strides = array<i32>} : memref<16x256xf32, #tpu.memory_space<vmem>>, vector<16x256xf32>,
    %16 = vector.extract_strided_slice %14 {offsets = [0, 0], sizes = [16, 128], strides = [1, 1]} : vector<16x256xf32> to vector<16x128xf32>
    %17 = vector.extract_strided_slice %14 {offsets = [0, 128], sizes = [16, 128], strides = [1, 1]} : vector<16x256xf32> to vector<16x128xf32>
    %c0_13 = arith.constant 0 : index
    %c0_14 = arith.constant 0 : index
    %18 = vector.load %arg2[%c0_13, %c0_14] : memref<16x128xf32, #tpu.memory_space<vmem>>, vector<16x128xf32>
    %cst_15 = arith.constant 5.000000e-01 : f32
    %19 = vector.broadcast %cst_15 : f32 to vector<16x128xf32>
    %20 = arith.mulf %19, %17 : vector<16x128xf32>
    %21 = math.exp %20 : vector<16x128xf32>
    %22 = arith.mulf %18, %21 : vector<16x128xf32>
    %23 = arith.addf %16, %22 : vector<16x128xf32>
    %24 = arith.truncf %23 : vector<16x128xf32> to vector<16x128xbf16>
    %c0_16 = arith.constant 0 : index
    %c0_17 = arith.constant 0 : index
    %25 = vector.load %arg7[%c0_16, %c0_17] : memref<128x512xbf16, #tpu.memory_space<vmem>>, vector<128x512xbf16>
    %cst_18 = arith.constant dense<0.000000e+00> : vector<16x512xf32>
    %26 = tpu.matmul %24, %25, %cst_18 {dimension_numbers = #tpu.dot_dimension_numbers<[1], [0], [0], [1], [0, 0, 1, 1], [], []>} : vector<16x128xbf16>, vector<128x512xbf16>, vector<16x512xf32> -> vector<16x512xf32>
    %c0_19 = arith.constant 0 : index
    %c0_20 = arith.constant 0 : index
    %27 = vector.load %arg8[%c0_19, %c0_20] : memref<1x512xf32, #tpu.memory_space<vmem>>, vector<1x512xf32>
    %28 = vector.broadcast %27 : vector<1x512xf32> to vector<16x512xf32>
    %29 = arith.addf %26, %28 : vector<16x512xf32>
    %cst_21 = arith.constant 0.000000e+00 : f32
    %30 = vector.broadcast %cst_21 : f32 to vector<16x512xf32>
    %31 = arith.maximumf %29, %30 : vector<16x512xf32>
    %32 = arith.truncf %31 : vector<16x512xf32> to vector<16x512xbf16>
    %c0_22 = arith.constant 0 : index
    %c0_23 = arith.constant 0 : index
    %33 = vector.load %arg9[%c0_22, %c0_23] : memref<512x784xbf16, #tpu.memory_space<vmem>>, vector<512x784xbf16>
    %cst_24 = arith.constant dense<0.000000e+00> : vector<16x784xf32>
    %34 = tpu.matmul %32, %33, %cst_24 {dimension_numbers = #tpu.dot_dimension_numbers<[1], [0], [0], [1], [0, 0, 1, 1], [], []>} : vector<16x512xbf16>, vector<512x784xbf16>, vector<16x784xf32> -> vector<16x784xf32>
    %c0_25 = arith.constant 0 : index
    %c0_26 = arith.constant 0 : index
    %35 = vector.load %arg10[%c0_25, %c0_26] : memref<1x784xf32, #tpu.memory_space<vmem>>, vector<1x784xf32>
    %36 = vector.broadcast %35 : vector<1x784xf32> to vector<16x784xf32>
    %37 = arith.addf %34, %36 : vector<16x784xf32>
    %38 = arith.negf %37 : vector<16x784xf32>
    %39 = math.exp %38 : vector<16x784xf32>
    %cst_27 = arith.constant 1.000000e+00 : f32
    %40 = vector.broadcast %cst_27 : f32 to vector<16x784xf32>
    %41 = arith.addf %40, %39 : vector<16x784xf32>
    %42 = arith.divf %40, %41 : vector<16x784xf32>
    %43 = arith.truncf %42 : vector<16x784xf32> to vector<16x784xbf16>
    %c0_28 = arith.constant 0 : index
    %c0_29 = arith.constant 0 : index
    %44 = vector.load %arg11[%c0_28, %c0_29] : memref<16x784xbf16, #tpu.memory_space<vmem>>, vector<16x784xbf16>
    tpu.vector_store %arg11[%c0_28, %c0_29], %43 {strides = array<i32>} : memref<16x784xbf16, #tpu.memory_space<vmem>>, vector<16x784xbf16>,
    return
  }
  func.func @transform_0(%arg0: i32) -> (i32, i32) {
    %c0_i32 = arith.constant 0 : i32
    %c0_i32_0 = arith.constant 0 : i32
    return %arg0, %c0_i32 : i32, i32
  }
  func.func @transform_1(%arg0: i32) -> (i32, i32) {
    %c0_i32 = arith.constant 0 : i32
    %c0_i32_0 = arith.constant 0 : i32
    return %arg0, %c0_i32 : i32, i32
  }
  func.func @transform_2(%arg0: i32) -> (i32, i32) {
    %c0_i32 = arith.constant 0 : i32
    %c0_i32_0 = arith.constant 0 : i32
    %c0_i32_1 = arith.constant 0 : i32
    return %c0_i32, %c0_i32_0 : i32, i32
  }
  func.func @transform_3(%arg0: i32) -> (i32, i32) {
    %c0_i32 = arith.constant 0 : i32
    %c0_i32_0 = arith.constant 0 : i32
    %c0_i32_1 = arith.constant 0 : i32
    return %c0_i32, %c0_i32_0 : i32, i32
  }
  func.func @transform_4(%arg0: i32) -> (i32, i32) {
    %c0_i32 = arith.constant 0 : i32
    %c0_i32_0 = arith.constant 0 : i32
    %c0_i32_1 = arith.constant 0 : i32
    return %c0_i32, %c0_i32_0 : i32, i32
  }
  func.func @transform_5(%arg0: i32) -> (i32, i32) {
    %c0_i32 = arith.constant 0 : i32
    %c0_i32_0 = arith.constant 0 : i32
    %c0_i32_1 = arith.constant 0 : i32
    return %c0_i32, %c0_i32_0 : i32, i32
  }
  func.func @transform_6(%arg0: i32) -> (i32, i32) {
    %c0_i32 = arith.constant 0 : i32
    %c0_i32_0 = arith.constant 0 : i32
    %c0_i32_1 = arith.constant 0 : i32
    return %c0_i32, %c0_i32_0 : i32, i32
  }
  func.func @transform_7(%arg0: i32) -> (i32, i32) {
    %c0_i32 = arith.constant 0 : i32
    %c0_i32_0 = arith.constant 0 : i32
    %c0_i32_1 = arith.constant 0 : i32
    return %c0_i32, %c0_i32_0 : i32, i32
  }
  func.func @transform_8(%arg0: i32) -> (i32, i32) {
    %c0_i32 = arith.constant 0 : i32
    %c0_i32_0 = arith.constant 0 : i32
    %c0_i32_1 = arith.constant 0 : i32
    return %c0_i32, %c0_i32_0 : i32, i32
  }
  func.func @transform_9(%arg0: i32) -> (i32, i32) {
    %c0_i32 = arith.constant 0 : i32
    %c0_i32_0 = arith.constant 0 : i32
    %c0_i32_1 = arith.constant 0 : i32
    return %c0_i32, %c0_i32_0 : i32, i32
  }
  func.func @transform_10(%arg0: i32) -> (i32, i32) {
    %c0_i32 = arith.constant 0 : i32
    %c0_i32_0 = arith.constant 0 : i32
    return %arg0, %c0_i32 : i32, i32
  }
  func.func @transform_11(%arg0: i32) -> (i32, i32) {
    %c0_i32 = arith.constant 0 : i32
    %c0_i32_0 = arith.constant 0 : i32
    return %arg0, %c0_i32 : i32, i32
  }
}

</mosaic_0001>

<bundles_post_ra>
// kernel: tpu_custom_call.1
= control target key start
LH: loop header
LB: loop body
LE: loop exit
PB: predicated region body
PF: predicated region fallthrough
CT: control target
= control target key end

     0   :  { %17 = vsyncpa [#allocation3], 0  ;;  %vm1259_vm0 = vcmask 130048   ;;  %s7689_s0 = inlined_call_operand.vmem [shape: f32[16,784], index: 0, kind: input, shape index: {}]   ;;  %s7690_s1 = inlined_call_operand.vmem [shape: f32[16,128], index: 1, kind: input, shape index: {}]   ;;  %s7691_s2 = inlined_call_operand.vmem [shape: bf16[784,512], index: 2, kind: input, shape index: {}]   ;;  %s7692_s3 = inlined_call_operand.vmem [shape: f32[1,512], index: 3, kind: input, shape index: {}]   ;;  %s7693_s4 = inlined_call_operand.vmem [shape: bf16[512,256], index: 4, kind: input, shape index: {}]   ;;  %s7694_s5 = inlined_call_operand.vmem [shape: f32[1,256], index: 5, kind: input, shape index: {}]   ;;  %s7695_s6 = inlined_call_operand.vmem [shape: bf16[128,512], index: 6, kind: input, shape index: {}]   ;;  %s7696_s7 = inlined_call_operand.vmem [shape: f32[1,512], index: 7, kind: input, shape index: {}]   ;;  %s7697_s8 = inlined_call_operand.vmem [shape: bf16[512,784], index: 8, kind: input, shape index: {}]   ;;  %s7698_s9 = inlined_call_operand.vmem [shape: f32[1,784], index: 9, kind: input, shape index: {}]   ;;  %s7699_s10 = inlined_call_operand.hbm [shape: bf16[16,784], index: 10, kind: output, shape index: {0}]   ;;  %s7700_s11 = inlined_call_operand.hbm [shape: f32[16,256], index: 11, kind: output, shape index: {1}]  }
   0x1   :  { %v5047_v0 = vld [vmem:[%s7691_s2 + $0x4] ss:$16 sps:$4 sm:$0xff]   ;;  %v5049_v1 = vld [vmem:[%s7691_s2 + $0xc] ss:$16 sps:$4 sm:$0xff]   ;;  %v5051_v2 = vld [vmem:[%s7691_s2] ss:$16 sps:$4 sm:$0xff]  }
   0x2   :  { %1263 = vmatprep.subr.bf16.mxu0 %v5047_v0  ;;  %v5052_v3 = vld [vmem:[%s7691_s2 + $0x8] ss:$16 sps:$4 sm:$0xff]   ;;  %1435 = vmatprep.subr.bf16.mxu1 %v5049_v1  ;;  %v5053_v4 = vld [vmem:[%s7691_s2 + $0x24] ss:$16 sps:$4 sm:$0xff]   ;;  %v5055_v5 = vld [vmem:[%s7691_s2 + $0x2c] ss:$16 sps:$4 sm:$0xff]  }
   0x3   :  { %1264 = vmatpush1.bf16.msra.mxu0 %v5051_v2  ;;  %1436 = vmatpush1.bf16.msra.mxu1 %v5052_v3  ;;  %v5057_v6 = vld [vmem:[%s7691_s2 + $0x20] ss:$16 sps:$4 sm:$0xff]   ;;  %v5058_v7 = vld [vmem:[%s7691_s2 + $0x28] ss:$16 sps:$4 sm:$0xff]   ;;  %v5059_v8 = vld [vmem:[%s7691_s2 + $0x44] ss:$16 sps:$4 sm:$0xff]  }
   0x4   :  { %1265 = vmatprep.subr.bf16.mxu0 %v5053_v4  ;;  %1437 = vmatprep.subr.bf16.mxu1 %v5055_v5  ;;  %v5061_v9 = vld [vmem:[%s7691_s2 + $0x4c] ss:$16 sps:$4 sm:$0xff]   ;;  %v5063_v10 = vld [vmem:[%s7691_s2 + $0x40] ss:$16 sps:$4 sm:$0xff]   ;;  %v5064_v11 = vld [vmem:[%s7691_s2 + $0x48] ss:$16 sps:$4 sm:$0xff]  }
   0x5   :  { %v5065_v12 = vld [vmem:[%s7691_s2 + $0x64] ss:$16 sps:$4 sm:$0xff]   ;;  %v5067_v13 = vld [vmem:[%s7691_s2 + $0x6c] ss:$16 sps:$4 sm:$0xff]   ;;  %v5069_v14 = vld [vmem:[%s7691_s2 + $0x60] ss:$16 sps:$4 sm:$0xff]  }
   0x6   :  { %v5070_v15 = vld [vmem:[%s7691_s2 + $0x68] ss:$16 sps:$4 sm:$0xff]   ;;  %v5071_v16 = vld [vmem:[%s7691_s2 + $0x84] ss:$16 sps:$4 sm:$0xff]   ;;  %v5073_v17 = vld [vmem:[%s7691_s2 + $0x8c] ss:$16 sps:$4 sm:$0xff]  }
   0x7   :  { %1266 = vmatpush1.bf16.msra.mxu0 %v5057_v6  ;;  %1438 = vmatpush1.bf16.msra.mxu1 %v5058_v7  ;;  %v5075_v18 = vld [vmem:[%s7691_s2 + $0x80] ss:$16 sps:$4 sm:$0xff]   ;;  %v5076_v19 = vld [vmem:[%s7691_s2 + $0x88] ss:$16 sps:$4 sm:$0xff]   ;;  %v5077_v20 = vld [vmem:[%s7691_s2 + $0xa4] ss:$16 sps:$4 sm:$0xff]  }
   0x8   :  { %1267 = vmatprep.subr.bf16.mxu0 %v5059_v8  ;;  %1439 = vmatprep.subr.bf16.mxu1 %v5061_v9  ;;  %v5079_v21 = vld [vmem:[%s7691_s2 + $0xac] ss:$16 sps:$4 sm:$0xff]   ;;  %v5081_v22 = vld [vmem:[%s7691_s2 + $0xa0] ss:$16 sps:$4 sm:$0xff]   ;;  %v5082_v23 = vld [vmem:[%s7691_s2 + $0xa8] ss:$16 sps:$4 sm:$0xff]  }
   0x9   :  { %v5083_v24 = vld [vmem:[%s7691_s2 + $0xc4] ss:$16 sps:$4 sm:$0xff]   ;;  %v5085_v25 = vld [vmem:[%s7691_s2 + $0xcc] ss:$16 sps:$4 sm:$0xff]   ;;  %v5087_v26 = vld [vmem:[%s7691_s2 + $0xc0] ss:$16 sps:$4 sm:$0xff]  }
   0xa   :  { %v5088_v27 = vld [vmem:[%s7691_s2 + $0xc8] ss:$16 sps:$4 sm:$0xff]   ;;  %v5089_v28 = vld [vmem:[%s7691_s2 + $0xe4] ss:$16 sps:$4 sm:$0xff]   ;;  %v5091_v29 = vld [vmem:[%s7691_s2 + $0xec] ss:$16 sps:$4 sm:$0xff]  }
   0xb   :  { %1268 = vmatpush1.bf16.msra.mxu0 %v5063_v10  ;;  %1440 = vmatpush1.bf16.msra.mxu1 %v5064_v11  ;;  %v5093_v30 = vld [vmem:[%s7691_s2 + $0xe0] ss:$16 sps:$4 sm:$0xff]   ;;  %v5094_v31 = vld [vmem:[%s7691_s2 + $0xe8] ss:$16 sps:$4 sm:$0xff]   ;;  %v5095_v32 = vld [vmem:[%s7691_s2 + $0x104] ss:$16 sps:$4 sm:$0xff]  }
   0xc   :  { %1269 = vmatprep.subr.bf16.mxu0 %v5065_v12  ;;  %1441 = vmatprep.subr.bf16.mxu1 %v5067_v13  ;;  %v5097_v33 = vld [vmem:[%s7691_s2 + $0x10c] ss:$16 sps:$4 sm:$0xff]   ;;  %v5099_v34 = vld [vmem:[%s7691_s2 + $0x100] ss:$16 sps:$4 sm:$0xff]   ;;  %v5100_v35 = vld [vmem:[%s7691_s2 + $0x108] ss:$16 sps:$4 sm:$0xff]  }
   0xd   :  { %v5101_v36 = vld [vmem:[%s7691_s2 + $0x124] ss:$16 sps:$4 sm:$0xff]   ;;  %v5103_v37 = vld [vmem:[%s7691_s2 + $0x12c] ss:$16 sps:$4 sm:$0xff]   ;;  %v5105_v38 = vld [vmem:[%s7691_s2 + $0x120] ss:$16 sps:$4 sm:$0xff]  }
   0xe   :  { %v5106_v39 = vld [vmem:[%s7691_s2 + $0x128] ss:$16 sps:$4 sm:$0xff]   ;;  %v5107_v40 = vld [vmem:[%s7691_s2 + $0x144] ss:$16 sps:$4 sm:$0xff]   ;;  %v5109_v41 = vld [vmem:[%s7691_s2 + $0x14c] ss:$16 sps:$4 sm:$0xff]  }
   0xf   :  { %1270 = vmatpush1.bf16.msra.mxu0 %v5069_v14  ;;  %1442 = vmatpush1.bf16.msra.mxu1 %v5070_v15  ;;  %v5111_v42 = vld [vmem:[%s7691_s2 + $0x140] ss:$16 sps:$4 sm:$0xff]   ;;  %v5112_v43 = vld [vmem:[%s7691_s2 + $0x148] ss:$16 sps:$4 sm:$0xff]   ;;  %v5113_v44 = vld [vmem:[%s7691_s2 + $0x164] ss:$16 sps:$4 sm:$0xff]  }
  0x10   :  { %1271 = vmatprep.subr.bf16.mxu0 %v5071_v16  ;;  %1443 = vmatprep.subr.bf16.mxu1 %v5073_v17  ;;  %v5115_v45 = vld [vmem:[%s7691_s2 + $0x16c] ss:$16 sps:$4 sm:$0xff]   ;;  %v48_v47 = vld [vmem:[%s7689_s0 + $0x40] sm:$0xff]  ;;  %v5118_v49 = vld [vmem:[%s7691_s2 + $0x168] ss:$16 sps:$4 sm:$0xff]  }
  0x11   :  { %v41_v46 = vld [vmem:[%s7689_s0 + $0x8] sm:$0xff]  ;;  %v5117_v48 = vld [vmem:[%s7691_s2 + $0x160] ss:$16 sps:$4 sm:$0xff]   ;;  %v5119_v51 = vld [vmem:[%s7691_s2 + $0x184] ss:$16 sps:$4 sm:$0xff]  }
  0x12   :  { %v55_v50 = vpack.c.bf16 %v48_v47, %v41_v46  ;;  %v5121_v52 = vld [vmem:[%s7691_s2 + $0x18c] ss:$16 sps:$4 sm:$0xff]   ;;  %v5123_v53 = vld [vmem:[%s7691_s2 + $0x180] ss:$16 sps:$4 sm:$0xff]   ;;  %v5124_v54 = vld [vmem:[%s7691_s2 + $0x188] ss:$16 sps:$4 sm:$0xff]  }
  0x13   :  { %1272 = vmatpush1.bf16.msra.mxu0 %v5075_v18  ;;  %1444 = vmatpush1.bf16.msra.mxu1 %v5076_v19  ;;  %v5125_v55 = vld [vmem:[%s7691_s2 + $0x1a4] ss:$16 sps:$4 sm:$0xff]   ;;  %v5127_v56 = vld [vmem:[%s7691_s2 + $0x1ac] ss:$16 sps:$4 sm:$0xff]   ;;  %v5129_v57 = vld [vmem:[%s7691_s2 + $0x1a0] ss:$16 sps:$4 sm:$0xff]  }
  0x14   :  { %1273 = vmatprep.subr.bf16.mxu0 %v5077_v20  ;;  %1445 = vmatprep.subr.bf16.mxu1 %v5079_v21  ;;  %v5130_v58 = vld [vmem:[%s7691_s2 + $0x1a8] ss:$16 sps:$4 sm:$0xff]   ;;  %v5131_v59 = vld [vmem:[%s7691_s2 + $0x1c4] ss:$16 sps:$4 sm:$0xff]   ;;  %v5133_v60 = vld [vmem:[%s7691_s2 + $0x1cc] ss:$16 sps:$4 sm:$0xff]  }
  0x15   :  { %1295 = vmatprep.mubr.bf16.mxu0 %v55_v50  ;;  %1467 = vmatprep.mubr.bf16.mxu1 %v55_v50  ;;  %v5135_v61 = vld [vmem:[%s7691_s2 + $0x1c0] ss:$16 sps:$4 sm:$0xff]   ;;  %v5136_v62 = vld [vmem:[%s7691_s2 + $0x1c8] ss:$16 sps:$4 sm:$0xff]   ;;  %v5137_v63 = vld [vmem:[%s7691_s2 + $0x1e4] ss:$16 sps:$4 sm:$0xff]  }
  0x16   :  { %v5139_v0 = vld [vmem:[%s7691_s2 + $0x1ec] ss:$16 sps:$4 sm:$0xff]   ;;  %v5141_v1 = vld [vmem:[%s7691_s2 + $0x1e0] ss:$16 sps:$4 sm:$0xff]   ;;  %v5142_v2 = vld [vmem:[%s7691_s2 + $0x1e8] ss:$16 sps:$4 sm:$0xff]  }
  0x17   :  { %1274 = vmatpush1.bf16.msra.mxu0 %v5081_v22  ;;  %1446 = vmatpush1.bf16.msra.mxu1 %v5082_v23  ;;  %v5145_v3 = vld [vmem:[%s7691_s2 + $0x204] ss:$16 sps:$4 sm:$0xff]   ;;  %v47_v5 = vld [vmem:[%s7689_s0 + $0x38] sm:$0xff]  ;;  %v5143_v7 = vld [vmem:[%s7691_s2 + $0x200] ss:$16 sps:$4 sm:$0xff]  }
  0x18   :  { %1275 = vmatprep.subr.bf16.mxu0 %v5083_v24  ;;  %1447 = vmatprep.subr.bf16.mxu1 %v5085_v25  ;;  %v40_v4 = vld [vmem:[%s7689_s0] sm:$0xff]  ;;  %v5148_v6 = vld [vmem:[%s7691_s2 + $0x20c] ss:$16 sps:$4 sm:$0xff]   ;;  %v5146_v8 = vld [vmem:[%s7691_s2 + $0x208] ss:$16 sps:$4 sm:$0xff]  }
  0x19   :  { %v54_v9 = vpack.c.bf16 %v47_v5, %v40_v4  ;;  %v5151_v10 = vld [vmem:[%s7691_s2 + $0x224] ss:$16 sps:$4 sm:$0xff]   ;;  %v5154_v11 = vld [vmem:[%s7691_s2 + $0x22c] ss:$16 sps:$4 sm:$0xff]   ;;  %v5149_v12 = vld [vmem:[%s7691_s2 + $0x220] ss:$16 sps:$4 sm:$0xff]  }
  0x1a   :  { %v5152_v13 = vld [vmem:[%s7691_s2 + $0x228] ss:$16 sps:$4 sm:$0xff]   ;;  %v5157_v14 = vld [vmem:[%s7691_s2 + $0x244] ss:$16 sps:$4 sm:$0xff]   ;;  %v5160_v15 = vld [vmem:[%s7691_s2 + $0x24c] ss:$16 sps:$4 sm:$0xff]  }
  0x1b   :  { %1276 = vmatpush1.bf16.msra.mxu0 %v5087_v26  ;;  %1448 = vmatpush1.bf16.msra.mxu1 %v5088_v27  ;;  %v5155_v16 = vld [vmem:[%s7691_s2 + $0x240] ss:$16 sps:$4 sm:$0xff]   ;;  %v5158_v17 = vld [vmem:[%s7691_s2 + $0x248] ss:$16 sps:$4 sm:$0xff]   ;;  %v5163_v18 = vld [vmem:[%s7691_s2 + $0x264] ss:$16 sps:$4 sm:$0xff]  }
  0x1c   :  { %1277 = vmatprep.subr.bf16.mxu0 %v5089_v28  ;;  %1449 = vmatprep.subr.bf16.mxu1 %v5091_v29  ;;  %v5166_v19 = vld [vmem:[%s7691_s2 + $0x26c] ss:$16 sps:$4 sm:$0xff]   ;;  %v5161_v20 = vld [vmem:[%s7691_s2 + $0x260] ss:$16 sps:$4 sm:$0xff]   ;;  %v5164_v21 = vld [vmem:[%s7691_s2 + $0x268] ss:$16 sps:$4 sm:$0xff]  }
  0x1d   :  { %v5169_v22 = vld [vmem:[%s7691_s2 + $0x284] ss:$16 sps:$4 sm:$0xff]   ;;  %v5172_v23 = vld [vmem:[%s7691_s2 + $0x28c] ss:$16 sps:$4 sm:$0xff]   ;;  %v5167_v24 = vld [vmem:[%s7691_s2 + $0x280] ss:$16 sps:$4 sm:$0xff]  }
  0x1e   :  { %v5170_v25 = vld [vmem:[%s7691_s2 + $0x288] ss:$16 sps:$4 sm:$0xff]   ;;  %v5175_v26 = vld [vmem:[%s7691_s2 + $0x2a4] ss:$16 sps:$4 sm:$0xff]   ;;  %v5178_v27 = vld [vmem:[%s7691_s2 + $0x2ac] ss:$16 sps:$4 sm:$0xff]  }
  0x1f   :  { %1278 = vmatpush1.bf16.msra.mxu0 %v5093_v30  ;;  %1450 = vmatpush1.bf16.msra.mxu1 %v5094_v31  ;;  %v5173_v28 = vld [vmem:[%s7691_s2 + $0x2a0] ss:$16 sps:$4 sm:$0xff]   ;;  %v5176_v29 = vld [vmem:[%s7691_s2 + $0x2a8] ss:$16 sps:$4 sm:$0xff]   ;;  %v5181_v30 = vld [vmem:[%s7691_s2 + $0x2c4] ss:$16 sps:$4 sm:$0xff]  }
  0x20   :  { %1279 = vmatprep.subr.bf16.mxu0 %v5095_v32  ;;  %1451 = vmatprep.subr.bf16.mxu1 %v5097_v33  ;;  %v5184_v31 = vld [vmem:[%s7691_s2 + $0x2cc] ss:$16 sps:$4 sm:$0xff]   ;;  %v50_v33 = vld [vmem:[%s7689_s0 + $0x50] sm:$0xff]  ;;  %v5230_v4 = vld [vmem:[%s7691_s2 + $0x3c8] ss:$16 sps:$4 sm:$0xff]  }
  0x21   :  { %v43_v32 = vld [vmem:[%s7689_s0 + $0x18] sm:$0xff]  ;;  %v5197_v47 = vld [vmem:[%s7691_s2 + $0x320] ss:$16 sps:$4 sm:$0xff]   ;;  %v5235_v5 = vld [vmem:[%s7691_s2 + $0x3e4] ss:$16 sps:$4 sm:$0xff]  }
  0x22   :  { %v5202_v46 = vld [vmem:[%s7691_s2 + $0x32c] ss:$16 sps:$4 sm:$0xff]  }
  0x23   :  { %1280 = vmatpush1.bf16.msra.mxu0 %v5099_v34  ;;  %1452 = vmatpush1.bf16.msra.mxu1 %v5100_v35  ;;  %v5179_v34 = vld [vmem:[%s7691_s2 + $0x2c0] ss:$16 sps:$4 sm:$0xff]   ;;  %v5182_v35 = vld [vmem:[%s7691_s2 + $0x2c8] ss:$16 sps:$4 sm:$0xff]   ;;  %v5208_v50 = vld [vmem:[%s7691_s2 + $0x34c] ss:$16 sps:$4 sm:$0xff]  }
  0x24   :  { %1281 = vmatprep.subr.bf16.mxu0 %v5101_v36  ;;  %1453 = vmatprep.subr.bf16.mxu1 %v5103_v37  ;;  %v57_v36 = vpack.c.bf16 %v50_v33, %v43_v32  ;;  %v5187_v37 = vld [vmem:[%s7691_s2 + $0x2e4] ss:$16 sps:$4 sm:$0xff]   ;;  %v5268_v32 = vld [vmem:[%s7691_s2 + $0x48c] ss:$16 sps:$4 sm:$0xff]   ;;  %v5263_v33 = vld [vmem:[%s7691_s2 + $0x480] ss:$16 sps:$4 sm:$0xff]  }
  0x27   :  { %1282 = vmatpush1.bf16.msra.mxu0 %v5105_v38  ;;  %1454 = vmatpush1.bf16.msra.mxu1 %v5106_v39  ;;  %v5190_v38 = vld [vmem:[%s7691_s2 + $0x2ec] ss:$16 sps:$4 sm:$0xff]   ;;  %v5185_v39 = vld [vmem:[%s7691_s2 + $0x2e0] ss:$16 sps:$4 sm:$0xff]  }
  0x28   :  { %1283 = vmatprep.subr.bf16.mxu0 %v5107_v40  ;;  %1455 = vmatprep.subr.bf16.mxu1 %v5109_v41  ;;  %v5188_v40 = vld [vmem:[%s7691_s2 + $0x2e8] ss:$16 sps:$4 sm:$0xff]   ;;  %v5193_v41 = vld [vmem:[%s7691_s2 + $0x304] ss:$16 sps:$4 sm:$0xff]  }
  0x2b   :  { %1284 = vmatpush1.bf16.msra.mxu0 %v5111_v42  ;;  %1456 = vmatpush1.bf16.msra.mxu1 %v5112_v43  ;;  %v5196_v42 = vld [vmem:[%s7691_s2 + $0x30c] ss:$16 sps:$4 sm:$0xff]   ;;  %v5191_v43 = vld [vmem:[%s7691_s2 + $0x300] ss:$16 sps:$4 sm:$0xff]  }
  0x2c   :  { %1285 = vmatprep.subr.bf16.mxu0 %v5113_v44  ;;  %1457 = vmatprep.subr.bf16.mxu1 %v5115_v45  ;;  %v5194_v44 = vld [vmem:[%s7691_s2 + $0x308] ss:$16 sps:$4 sm:$0xff]   ;;  %v5199_v45 = vld [vmem:[%s7691_s2 + $0x324] ss:$16 sps:$4 sm:$0xff]  }
  0x2f   :  { %1286 = vmatpush1.bf16.msra.mxu0 %v5117_v48  ;;  %1458 = vmatpush1.bf16.msra.mxu1 %v5118_v49  ;;  %v5200_v48 = vld [vmem:[%s7691_s2 + $0x328] ss:$16 sps:$4 sm:$0xff]   ;;  %v5205_v49 = vld [vmem:[%s7691_s2 + $0x344] ss:$16 sps:$4 sm:$0xff]  }
  0x30   :  { %1287 = vmatprep.subr.bf16.mxu0 %v5119_v51  ;;  %1459 = vmatprep.subr.bf16.mxu1 %v5121_v52  ;;  %v5203_v51 = vld [vmem:[%s7691_s2 + $0x340] ss:$16 sps:$4 sm:$0xff]   ;;  %v5206_v52 = vld [vmem:[%s7691_s2 + $0x348] ss:$16 sps:$4 sm:$0xff]  }
  0x33   :  { %1288 = vmatpush1.bf16.msra.mxu0 %v5123_v53  ;;  %1460 = vmatpush1.bf16.msra.mxu1 %v5124_v54  ;;  %v5211_v53 = vld [vmem:[%s7691_s2 + $0x364] ss:$16 sps:$4 sm:$0xff]   ;;  %v5214_v54 = vld [vmem:[%s7691_s2 + $0x36c] ss:$16 sps:$4 sm:$0xff]  }
  0x34   :  { %1289 = vmatprep.subr.bf16.mxu0 %v5125_v55  ;;  %1461 = vmatprep.subr.bf16.mxu1 %v5127_v56  ;;  %v5209_v55 = vld [vmem:[%s7691_s2 + $0x360] ss:$16 sps:$4 sm:$0xff]   ;;  %v5212_v56 = vld [vmem:[%s7691_s2 + $0x368] ss:$16 sps:$4 sm:$0xff]  }
  0x37   :  { %1290 = vmatpush1.bf16.msra.mxu0 %v5129_v57  ;;  %1462 = vmatpush1.bf16.msra.mxu1 %v5130_v58  ;;  %v5217_v57 = vld [vmem:[%s7691_s2 + $0x384] ss:$16 sps:$4 sm:$0xff]   ;;  %v5220_v58 = vld [vmem:[%s7691_s2 + $0x38c] ss:$16 sps:$4 sm:$0xff]  }
  0x38   :  { %1291 = vmatprep.subr.bf16.mxu0 %v5131_v59  ;;  %1463 = vmatprep.subr.bf16.mxu1 %v5133_v60  ;;  %v5215_v59 = vld [vmem:[%s7691_s2 + $0x380] ss:$16 sps:$4 sm:$0xff]   ;;  %v5218_v60 = vld [vmem:[%s7691_s2 + $0x388] ss:$16 sps:$4 sm:$0xff]  }
  0x3b   :  { %1292 = vmatpush1.bf16.msra.mxu0 %v5135_v61  ;;  %1464 = vmatpush1.bf16.msra.mxu1 %v5136_v62  ;;  %v5223_v61 = vld [vmem:[%s7691_s2 + $0x3a4] ss:$16 sps:$4 sm:$0xff]   ;;  %v5226_v62 = vld [vmem:[%s7691_s2 + $0x3ac] ss:$16 sps:$4 sm:$0xff]  }
  0x3c   :  { %1293 = vmatprep.subr.bf16.mxu0 %v5137_v63  ;;  %1465 = vmatprep.subr.bf16.mxu1 %v5139_v0  ;;  %v5221_v63 = vld [vmem:[%s7691_s2 + $0x3a0] ss:$16 sps:$4 sm:$0xff]   ;;  %v5224_v0 = vld [vmem:[%s7691_s2 + $0x3a8] ss:$16 sps:$4 sm:$0xff]  }
  0x3f   :  { %1294 = vmatpush1.bf16.msra.mxu0 %v5141_v1  ;;  %1466 = vmatpush1.bf16.msra.mxu1 %v5142_v2  ;;  %v5229_v1 = vld [vmem:[%s7691_s2 + $0x3c4] ss:$16 sps:$4 sm:$0xff]   ;;  %v5232_v2 = vld [vmem:[%s7691_s2 + $0x3cc] ss:$16 sps:$4 sm:$0xff]  }
  0x40   :  { %1306 = vmatprep.subr.bf16.mxu0 %v5145_v3  ;;  %1478 = vmatprep.subr.bf16.mxu1 %v5148_v6  ;;  %v5227_v3 = vld [vmem:[%s7691_s2 + $0x3c0] ss:$16 sps:$4 sm:$0xff]   ;;  %v5238_v6 = vld [vmem:[%s7691_s2 + $0x3ec] ss:$16 sps:$4 sm:$0xff]  }
  0x42   :  { %1296 = vmatmul.mubr.bf16.vlgmr.msra.gmra.mrb[0].mxu0 %v54_v9  ;;  %1468 = vmatmul.mubr.bf16.vlgmr.msra.gmra.mrb[0].mxu1 %v54_v9  ;;  %v5241_v9 = vld [vmem:[%s7691_s2 + $0x404] ss:$16 sps:$4 sm:$0xff]  }
  0x43   :  { %1307 = vmatpush1.bf16.msra.mxu0 %v5143_v7  ;;  %1479 = vmatpush1.bf16.msra.mxu1 %v5146_v8  ;;  %v5233_v7 = vld [vmem:[%s7691_s2 + $0x3e0] ss:$16 sps:$4 sm:$0xff]   ;;  %v5236_v8 = vld [vmem:[%s7691_s2 + $0x3e8] ss:$16 sps:$4 sm:$0xff]  }
  0x44   :  { %1308 = vmatprep.subr.bf16.mxu0 %v5151_v10  ;;  %1480 = vmatprep.subr.bf16.mxu1 %v5154_v11  ;;  %v42_v10 = vld [vmem:[%s7689_s0 + $0x10] sm:$0xff]  ;;  %v49_v11 = vld [vmem:[%s7689_s0 + $0x48] sm:$0xff] }
  0x45   :  { %1338 = vmatprep.mubr.bf16.mxu0 %v57_v36  ;;  %1510 = vmatprep.mubr.bf16.mxu1 %v57_v36  ;;  %v5274_v36 = vld [vmem:[%s7691_s2 + $0x4ac] ss:$16 sps:$4 sm:$0xff]  }
  0x47   :  { %1309 = vmatpush1.bf16.msra.mxu0 %v5149_v12  ;;  %1481 = vmatpush1.bf16.msra.mxu1 %v5152_v13  ;;  %v5244_v12 = vld [vmem:[%s7691_s2 + $0x40c] ss:$16 sps:$4 sm:$0xff]   ;;  %v5239_v13 = vld [vmem:[%s7691_s2 + $0x400] ss:$16 sps:$4 sm:$0xff]  }
  0x48   :  { %1310 = vmatprep.subr.bf16.mxu0 %v5157_v14  ;;  %1482 = vmatprep.subr.bf16.mxu1 %v5160_v15  ;;  %v5242_v14 = vld [vmem:[%s7691_s2 + $0x408] ss:$16 sps:$4 sm:$0xff]   ;;  %v56_v15 = vpack.c.bf16 %v49_v11, %v42_v10  ;;  %v5331_v11 = vld [vmem:[%s7691_s2 + $0x5e4] ss:$16 sps:$4 sm:$0xff]  }
  0x49   :  { %v5326_v10 = vld [vmem:[%s7691_s2 + $0x5c8] ss:$16 sps:$4 sm:$0xff]  }
  0x4b   :  { %1311 = vmatpush1.bf16.msra.mxu0 %v5155_v16  ;;  %1483 = vmatpush1.bf16.msra.mxu1 %v5158_v17  ;;  %v5247_v16 = vld [vmem:[%s7691_s2 + $0x424] ss:$16 sps:$4 sm:$0xff]   ;;  %v5250_v17 = vld [vmem:[%s7691_s2 + $0x42c] ss:$16 sps:$4 sm:$0xff]  }
  0x4c   :  { %1312 = vmatprep.subr.bf16.mxu0 %v5163_v18  ;;  %1484 = vmatprep.subr.bf16.mxu1 %v5166_v19  ;;  %v45_v18 = vld [vmem:[%s7689_s0 + $0x28] sm:$0xff]  ;;  %v5245_v19 = vld [vmem:[%s7691_s2 + $0x420] ss:$16 sps:$4 sm:$0xff]  }
  0x4f   :  { %1313 = vmatpush1.bf16.msra.mxu0 %v5161_v20  ;;  %1485 = vmatpush1.bf16.msra.mxu1 %v5164_v21  ;;  %v5248_v20 = vld [vmem:[%s7691_s2 + $0x428] ss:$16 sps:$4 sm:$0xff]   ;;  %v52_v21 = vld [vmem:[%s7689_s0 + $0x60] sm:$0xff] }
  0x50   :  { %1314 = vmatprep.subr.bf16.mxu0 %v5169_v22  ;;  %1486 = vmatprep.subr.bf16.mxu1 %v5172_v23  ;;  %v5253_v22 = vld [vmem:[%s7691_s2 + $0x444] ss:$16 sps:$4 sm:$0xff]   ;;  %v59_v23 = vpack.c.bf16 %v52_v21, %v45_v18  ;;  %v5340_v18 = vld [vmem:[%s7691_s2 + $0x60c] ss:$16 sps:$4 sm:$0xff]  }
  0x53   :  { %1315 = vmatpush1.bf16.msra.mxu0 %v5167_v24  ;;  %1487 = vmatpush1.bf16.msra.mxu1 %v5170_v25  ;;  %v5256_v24 = vld [vmem:[%s7691_s2 + $0x44c] ss:$16 sps:$4 sm:$0xff]   ;;  %v5251_v25 = vld [vmem:[%s7691_s2 + $0x440] ss:$16 sps:$4 sm:$0xff]  }
  0x54   :  { %1316 = vmatprep.subr.bf16.mxu0 %v5175_v26  ;;  %1488 = vmatprep.subr.bf16.mxu1 %v5178_v27  ;;  %v5254_v26 = vld [vmem:[%s7691_s2 + $0x448] ss:$16 sps:$4 sm:$0xff]   ;;  %v5259_v27 = vld [vmem:[%s7691_s2 + $0x464] ss:$16 sps:$4 sm:$0xff]  }
  0x57   :  { %1317 = vmatpush1.bf16.msra.mxu0 %v5173_v28  ;;  %1489 = vmatpush1.bf16.msra.mxu1 %v5176_v29  ;;  %v5262_v28 = vld [vmem:[%s7691_s2 + $0x46c] ss:$16 sps:$4 sm:$0xff]   ;;  %v5257_v29 = vld [vmem:[%s7691_s2 + $0x460] ss:$16 sps:$4 sm:$0xff]  }
  0x58   :  { %1318 = vmatprep.subr.bf16.mxu0 %v5181_v30  ;;  %1490 = vmatprep.subr.bf16.mxu1 %v5184_v31  ;;  %v5260_v30 = vld [vmem:[%s7691_s2 + $0x468] ss:$16 sps:$4 sm:$0xff]   ;;  %v5265_v31 = vld [vmem:[%s7691_s2 + $0x484] ss:$16 sps:$4 sm:$0xff]  }
  0x5b   :  { %1319 = vmatpush1.bf16.msra.mxu0 %v5179_v34  ;;  %1491 = vmatpush1.bf16.msra.mxu1 %v5182_v35  ;;  %v5266_v34 = vld [vmem:[%s7691_s2 + $0x488] ss:$16 sps:$4 sm:$0xff]   ;;  %v5271_v35 = vld [vmem:[%s7691_s2 + $0x4a4] ss:$16 sps:$4 sm:$0xff]  }
  0x5c   :  { %1320 = vmatprep.subr.bf16.mxu0 %v5187_v37  ;;  %1492 = vmatprep.subr.bf16.mxu1 %v5190_v38  ;;  %v5269_v37 = vld [vmem:[%s7691_s2 + $0x4a0] ss:$16 sps:$4 sm:$0xff]   ;;  %v5272_v38 = vld [vmem:[%s7691_s2 + $0x4a8] ss:$16 sps:$4 sm:$0xff]  }
  0x5f   :  { %1321 = vmatpush1.bf16.msra.mxu0 %v5185_v39  ;;  %1493 = vmatpush1.bf16.msra.mxu1 %v5188_v40  ;;  %v5277_v39 = vld [vmem:[%s7691_s2 + $0x4c4] ss:$16 sps:$4 sm:$0xff]   ;;  %v5280_v40 = vld [vmem:[%s7691_s2 + $0x4cc] ss:$16 sps:$4 sm:$0xff]  }
  0x60   :  { %1322 = vmatprep.subr.bf16.mxu0 %v5193_v41  ;;  %1494 = vmatprep.subr.bf16.mxu1 %v5196_v42  ;;  %v5275_v41 = vld [vmem:[%s7691_s2 + $0x4c0] ss:$16 sps:$4 sm:$0xff]   ;;  %v5278_v42 = vld [vmem:[%s7691_s2 + $0x4c8] ss:$16 sps:$4 sm:$0xff]  }
  0x63   :  { %1323 = vmatpush1.bf16.msra.mxu0 %v5191_v43  ;;  %1495 = vmatpush1.bf16.msra.mxu1 %v5194_v44  ;;  %v5283_v43 = vld [vmem:[%s7691_s2 + $0x4e4] ss:$16 sps:$4 sm:$0xff]   ;;  %v5286_v44 = vld [vmem:[%s7691_s2 + $0x4ec] ss:$16 sps:$4 sm:$0xff]  }
  0x64   :  { %1324 = vmatprep.subr.bf16.mxu0 %v5199_v45  ;;  %1496 = vmatprep.subr.bf16.mxu1 %v5202_v46  ;;  %v5281_v45 = vld [vmem:[%s7691_s2 + $0x4e0] ss:$16 sps:$4 sm:$0xff]   ;;  %v5284_v46 = vld [vmem:[%s7691_s2 + $0x4e8] ss:$16 sps:$4 sm:$0xff]  }
  0x67   :  { %1325 = vmatpush1.bf16.msra.mxu0 %v5197_v47  ;;  %1497 = vmatpush1.bf16.msra.mxu1 %v5200_v48  ;;  %v5289_v47 = vld [vmem:[%s7691_s2 + $0x504] ss:$16 sps:$4 sm:$0xff]   ;;  %v5292_v48 = vld [vmem:[%s7691_s2 + $0x50c] ss:$16 sps:$4 sm:$0xff]  }
  0x68   :  { %1326 = vmatprep.subr.bf16.mxu0 %v5205_v49  ;;  %1498 = vmatprep.subr.bf16.mxu1 %v5208_v50  ;;  %v5287_v49 = vld [vmem:[%s7691_s2 + $0x500] ss:$16 sps:$4 sm:$0xff]   ;;  %v5290_v50 = vld [vmem:[%s7691_s2 + $0x508] ss:$16 sps:$4 sm:$0xff]  }
  0x6b   :  { %1327 = vmatpush1.bf16.msra.mxu0 %v5203_v51  ;;  %1499 = vmatpush1.bf16.msra.mxu1 %v5206_v52  ;;  %v5295_v51 = vld [vmem:[%s7691_s2 + $0x524] ss:$16 sps:$4 sm:$0xff]   ;;  %v5298_v52 = vld [vmem:[%s7691_s2 + $0x52c] ss:$16 sps:$4 sm:$0xff]  }
  0x6c   :  { %1328 = vmatprep.subr.bf16.mxu0 %v5211_v53  ;;  %1500 = vmatprep.subr.bf16.mxu1 %v5214_v54  ;;  %v5293_v53 = vld [vmem:[%s7691_s2 + $0x520] ss:$16 sps:$4 sm:$0xff]   ;;  %v5296_v54 = vld [vmem:[%s7691_s2 + $0x528] ss:$16 sps:$4 sm:$0xff]  }
  0x6f   :  { %1329 = vmatpush1.bf16.msra.mxu0 %v5209_v55  ;;  %1501 = vmatpush1.bf16.msra.mxu1 %v5212_v56  ;;  %v5301_v55 = vld [vmem:[%s7691_s2 + $0x544] ss:$16 sps:$4 sm:$0xff]   ;;  %v5304_v56 = vld [vmem:[%s7691_s2 + $0x54c] ss:$16 sps:$4 sm:$0xff]  }
  0x70   :  { %1330 = vmatprep.subr.bf16.mxu0 %v5217_v57  ;;  %1502 = vmatprep.subr.bf16.mxu1 %v5220_v58  ;;  %v5299_v57 = vld [vmem:[%s7691_s2 + $0x540] ss:$16 sps:$4 sm:$0xff]   ;;  %v5302_v58 = vld [vmem:[%s7691_s2 + $0x548] ss:$16 sps:$4 sm:$0xff]  }
  0x73   :  { %1331 = vmatpush1.bf16.msra.mxu0 %v5215_v59  ;;  %1503 = vmatpush1.bf16.msra.mxu1 %v5218_v60  ;;  %v5307_v59 = vld [vmem:[%s7691_s2 + $0x564] ss:$16 sps:$4 sm:$0xff]   ;;  %v5310_v60 = vld [vmem:[%s7691_s2 + $0x56c] ss:$16 sps:$4 sm:$0xff]  }
  0x74   :  { %1332 = vmatprep.subr.bf16.mxu0 %v5223_v61  ;;  %1504 = vmatprep.subr.bf16.mxu1 %v5226_v62  ;;  %v5305_v61 = vld [vmem:[%s7691_s2 + $0x560] ss:$16 sps:$4 sm:$0xff]   ;;  %v5308_v62 = vld [vmem:[%s7691_s2 + $0x568] ss:$16 sps:$4 sm:$0xff]  }
  0x77   :  { %1333 = vmatpush1.bf16.msra.mxu0 %v5221_v63  ;;  %1505 = vmatpush1.bf16.msra.mxu1 %v5224_v0  ;;  %v5313_v63 = vld [vmem:[%s7691_s2 + $0x584] ss:$16 sps:$4 sm:$0xff]   ;;  %v5316_v0 = vld [vmem:[%s7691_s2 + $0x58c] ss:$16 sps:$4 sm:$0xff]  }
  0x78   :  { %1334 = vmatprep.subr.bf16.mxu0 %v5229_v1  ;;  %1506 = vmatprep.subr.bf16.mxu1 %v5232_v2  ;;  %v5311_v1 = vld [vmem:[%s7691_s2 + $0x580] ss:$16 sps:$4 sm:$0xff]   ;;  %v5314_v2 = vld [vmem:[%s7691_s2 + $0x588] ss:$16 sps:$4 sm:$0xff]  }
  0x7b   :  { %1335 = vmatpush1.bf16.msra.mxu0 %v5227_v3  ;;  %1507 = vmatpush1.bf16.msra.mxu1 %v5230_v4  ;;  %v5319_v3 = vld [vmem:[%s7691_s2 + $0x5a4] ss:$16 sps:$4 sm:$0xff]   ;;  %v5322_v4 = vld [vmem:[%s7691_s2 + $0x5ac] ss:$16 sps:$4 sm:$0xff]  }
  0x7c   :  { %1336 = vmatprep.subr.bf16.mxu0 %v5235_v5  ;;  %1508 = vmatprep.subr.bf16.mxu1 %v5238_v6  ;;  %v5317_v5 = vld [vmem:[%s7691_s2 + $0x5a0] ss:$16 sps:$4 sm:$0xff]   ;;  %v5320_v6 = vld [vmem:[%s7691_s2 + $0x5a8] ss:$16 sps:$4 sm:$0xff]  }
  0x7f   :  { %1337 = vmatpush1.bf16.msra.mxu0 %v5233_v7  ;;  %1509 = vmatpush1.bf16.msra.mxu1 %v5236_v8  ;;  %v5325_v7 = vld [vmem:[%s7691_s2 + $0x5c4] ss:$16 sps:$4 sm:$0xff]   ;;  %v5328_v8 = vld [vmem:[%s7691_s2 + $0x5cc] ss:$16 sps:$4 sm:$0xff]  }
  0x80   :  { %1349 = vmatprep.subr.bf16.mxu0 %v5241_v9  ;;  %1521 = vmatprep.subr.bf16.mxu1 %v5244_v12  ;;  %v5323_v9 = vld [vmem:[%s7691_s2 + $0x5c0] ss:$16 sps:$4 sm:$0xff]   ;;  %v5334_v12 = vld [vmem:[%s7691_s2 + $0x5ec] ss:$16 sps:$4 sm:$0xff]  }
  0x82   :  { %1339 = vmatmul.mubr.bf16.vlgmr.msra.gmra.mrb[0].mxu0 %v56_v15  ;;  %1511 = vmatmul.mubr.bf16.vlgmr.msra.gmra.mrb[0].mxu1 %v56_v15  ;;  %v44_v15 = vld [vmem:[%s7689_s0 + $0x20] sm:$0xff] }
  0x83   :  { %1350 = vmatpush1.bf16.msra.mxu0 %v5239_v13  ;;  %1522 = vmatpush1.bf16.msra.mxu1 %v5242_v14  ;;  %v5329_v13 = vld [vmem:[%s7691_s2 + $0x5e0] ss:$16 sps:$4 sm:$0xff]   ;;  %v5332_v14 = vld [vmem:[%s7691_s2 + $0x5e8] ss:$16 sps:$4 sm:$0xff]  }
  0x84   :  { %1351 = vmatprep.subr.bf16.mxu0 %v5247_v16  ;;  %1523 = vmatprep.subr.bf16.mxu1 %v5250_v17  ;;  %v51_v16 = vld [vmem:[%s7689_s0 + $0x58] sm:$0xff]  ;;  %v5337_v17 = vld [vmem:[%s7691_s2 + $0x604] ss:$16 sps:$4 sm:$0xff]  }
  0x85   :  { %1381 = vmatprep.mubr.bf16.mxu0 %v59_v23  ;;  %1553 = vmatprep.mubr.bf16.mxu1 %v59_v23  ;;  %v58_v21 = vpack.c.bf16 %v51_v16, %v44_v15  ;;  %v5913_v23 = vmov 0  }
  0x87   :  { %1352 = vmatpush1.bf16.msra.mxu0 %v5245_v19  ;;  %1524 = vmatpush1.bf16.msra.mxu1 %v5248_v20  ;;  %v5335_v19 = vld [vmem:[%s7691_s2 + $0x600] ss:$16 sps:$4 sm:$0xff]   ;;  %v5338_v20 = vld [vmem:[%s7691_s2 + $0x608] ss:$16 sps:$4 sm:$0xff]  }
  0x88   :  { %1353 = vmatprep.subr.bf16.mxu0 %v5253_v22  ;;  %1525 = vmatprep.subr.bf16.mxu1 %v5256_v24  ;;  %v5343_v22 = vld [vmem:[%s7693_s4 + $0x4] ss:$8 sps:$4 sm:$0xff]   ;;  %v46_v24 = vld [vmem:[%s7689_s0 + $0x30] sm:$0xff] }
  0x8b   :  { %1354 = vmatpush1.bf16.msra.mxu0 %v5251_v25  ;;  %1526 = vmatpush1.bf16.msra.mxu1 %v5254_v26  ;;  %v53_v25 = vld [vmem:[%s7689_s0 + $0x68] sm:$0xff] }
  0x8c   :  { %1355 = vmatprep.subr.bf16.mxu0 %v5259_v27  ;;  %1527 = vmatprep.subr.bf16.mxu1 %v5262_v28  ;;  %v5341_v26 = vld [vmem:[%s7693_s4] ss:$8 sps:$4 sm:$0xff]   ;;  %v60_v27 = vpack.c.bf16 %v53_v25, %v46_v24  ;;  %v5346_v28 = vld [vmem:[%s7693_s4 + $0x14] ss:$8 sps:$4 sm:$0xff]  }
  0x8f   :  { %1356 = vmatpush1.bf16.msra.mxu0 %v5257_v29  ;;  %1528 = vmatpush1.bf16.msra.mxu1 %v5260_v30  ;;  %v5344_v29 = vld [vmem:[%s7693_s4 + $0x10] ss:$8 sps:$4 sm:$0xff]   ;;  %v5349_v30 = vld [vmem:[%s7693_s4 + $0x24] ss:$8 sps:$4 sm:$0xff]  }
  0x90   :  { %1357 = vmatprep.subr.bf16.mxu0 %v5265_v31  ;;  %1529 = vmatprep.subr.bf16.mxu1 %v5268_v32  ;;  %v5347_v31 = vld [vmem:[%s7693_s4 + $0x20] ss:$8 sps:$4 sm:$0xff]   ;;  %v5352_v32 = vld [vmem:[%s7693_s4 + $0x34] ss:$8 sps:$4 sm:$0xff]  }
  0x93   :  { %1358 = vmatpush1.bf16.msra.mxu0 %v5263_v33  ;;  %1530 = vmatpush1.bf16.msra.mxu1 %v5266_v34  ;;  %v5350_v33 = vld [vmem:[%s7693_s4 + $0x30] ss:$8 sps:$4 sm:$0xff]   ;;  %v5355_v34 = vld [vmem:[%s7693_s4 + $0x44] ss:$8 sps:$4 sm:$0xff]  }
  0x94   :  { %1359 = vmatprep.subr.bf16.mxu0 %v5271_v35  ;;  %1531 = vmatprep.subr.bf16.mxu1 %v5274_v36  ;;  %v5353_v35 = vld [vmem:[%s7693_s4 + $0x40] ss:$8 sps:$4 sm:$0xff]   ;;  %v5358_v36 = vld [vmem:[%s7693_s4 + $0x54] ss:$8 sps:$4 sm:$0xff]  }
  0x97   :  { %1360 = vmatpush1.bf16.msra.mxu0 %v5269_v37  ;;  %1532 = vmatpush1.bf16.msra.mxu1 %v5272_v38  ;;  %v5356_v37 = vld [vmem:[%s7693_s4 + $0x50] ss:$8 sps:$4 sm:$0xff]   ;;  %v5361_v38 = vld [vmem:[%s7693_s4 + $0x64] ss:$8 sps:$4 sm:$0xff]  }
  0x98   :  { %1361 = vmatprep.subr.bf16.mxu0 %v5277_v39  ;;  %1533 = vmatprep.subr.bf16.mxu1 %v5280_v40  ;;  %v5359_v39 = vld [vmem:[%s7693_s4 + $0x60] ss:$8 sps:$4 sm:$0xff]   ;;  %v5364_v40 = vld [vmem:[%s7693_s4 + $0x74] ss:$8 sps:$4 sm:$0xff]  }
  0x9b   :  { %1362 = vmatpush1.bf16.msra.mxu0 %v5275_v41  ;;  %1534 = vmatpush1.bf16.msra.mxu1 %v5278_v42  ;;  %v5362_v41 = vld [vmem:[%s7693_s4 + $0x70] ss:$8 sps:$4 sm:$0xff]   ;;  %v5367_v42 = vld [vmem:[%s7693_s4 + $0x84] ss:$8 sps:$4 sm:$0xff]  }
  0x9c   :  { %1363 = vmatprep.subr.bf16.mxu0 %v5283_v43  ;;  %1535 = vmatprep.subr.bf16.mxu1 %v5286_v44  ;;  %v5365_v43 = vld [vmem:[%s7693_s4 + $0x80] ss:$8 sps:$4 sm:$0xff]   ;;  %v5370_v44 = vld [vmem:[%s7693_s4 + $0x94] ss:$8 sps:$4 sm:$0xff]  }
  0x9f   :  { %1364 = vmatpush1.bf16.msra.mxu0 %v5281_v45  ;;  %1536 = vmatpush1.bf16.msra.mxu1 %v5284_v46  ;;  %v5368_v45 = vld [vmem:[%s7693_s4 + $0x90] ss:$8 sps:$4 sm:$0xff]   ;;  %v5373_v46 = vld [vmem:[%s7693_s4 + $0xa4] ss:$8 sps:$4 sm:$0xff]  }
  0xa0   :  { %1365 = vmatprep.subr.bf16.mxu0 %v5289_v47  ;;  %1537 = vmatprep.subr.bf16.mxu1 %v5292_v48  ;;  %v5371_v47 = vld [vmem:[%s7693_s4 + $0xa0] ss:$8 sps:$4 sm:$0xff]   ;;  %v5376_v48 = vld [vmem:[%s7693_s4 + $0xb4] ss:$8 sps:$4 sm:$0xff]  }
  0xa3   :  { %1366 = vmatpush1.bf16.msra.mxu0 %v5287_v49  ;;  %1538 = vmatpush1.bf16.msra.mxu1 %v5290_v50  ;;  %v5374_v49 = vld [vmem:[%s7693_s4 + $0xb0] ss:$8 sps:$4 sm:$0xff]   ;;  %v5379_v50 = vld [vmem:[%s7693_s4 + $0xc4] ss:$8 sps:$4 sm:$0xff]  }
  0xa4   :  { %1367 = vmatprep.subr.bf16.mxu0 %v5295_v51  ;;  %1539 = vmatprep.subr.bf16.mxu1 %v5298_v52  ;;  %v5377_v51 = vld [vmem:[%s7693_s4 + $0xc0] ss:$8 sps:$4 sm:$0xff]   ;;  %v5382_v52 = vld [vmem:[%s7693_s4 + $0xd4] ss:$8 sps:$4 sm:$0xff]  }
  0xa7   :  { %1368 = vmatpush1.bf16.msra.mxu0 %v5293_v53  ;;  %1540 = vmatpush1.bf16.msra.mxu1 %v5296_v54  ;;  %v5380_v53 = vld [vmem:[%s7693_s4 + $0xd0] ss:$8 sps:$4 sm:$0xff]  }
  0xa8   :  { %1369 = vmatprep.subr.bf16.mxu0 %v5301_v55  ;;  %1541 = vmatprep.subr.bf16.mxu1 %v5304_v56 }
  0xab   :  { %1370 = vmatpush1.bf16.msra.mxu0 %v5299_v57  ;;  %1542 = vmatpush1.bf16.msra.mxu1 %v5302_v58 }
  0xac   :  { %1371 = vmatprep.subr.bf16.mxu0 %v5307_v59  ;;  %1543 = vmatprep.subr.bf16.mxu1 %v5310_v60 }
  0xaf   :  { %1372 = vmatpush1.bf16.msra.mxu0 %v5305_v61  ;;  %1544 = vmatpush1.bf16.msra.mxu1 %v5308_v62 }
  0xb0   :  { %1373 = vmatprep.subr.bf16.mxu0 %v5313_v63  ;;  %1545 = vmatprep.subr.bf16.mxu1 %v5316_v0 }
  0xb3   :  { %1374 = vmatpush1.bf16.msra.mxu0 %v5311_v1  ;;  %1546 = vmatpush1.bf16.msra.mxu1 %v5314_v2 }
  0xb4   :  { %1375 = vmatprep.subr.bf16.mxu0 %v5319_v3  ;;  %1547 = vmatprep.subr.bf16.mxu1 %v5322_v4 }
  0xb7   :  { %1376 = vmatpush1.bf16.msra.mxu0 %v5317_v5  ;;  %1548 = vmatpush1.bf16.msra.mxu1 %v5320_v6 }
  0xb8   :  { %1377 = vmatprep.subr.bf16.mxu0 %v5325_v7  ;;  %1549 = vmatprep.subr.bf16.mxu1 %v5328_v8 }
  0xbb   :  { %1378 = vmatpush1.bf16.msra.mxu0 %v5323_v9  ;;  %1550 = vmatpush1.bf16.msra.mxu1 %v5326_v10 }
  0xbc   :  { %1379 = vmatprep.subr.bf16.mxu0 %v5331_v11  ;;  %1551 = vmatprep.subr.bf16.mxu1 %v5334_v12 }
  0xbf   :  { %1380 = vmatpush1.bf16.msra.mxu0 %v5329_v13  ;;  %1552 = vmatpush1.bf16.msra.mxu1 %v5332_v14 }
  0xc0   :  { %1392 = vmatprep.subr.bf16.mxu0 %v5337_v17  ;;  %1564 = vmatprep.subr.bf16.mxu1 %v5340_v18 }
  0xc2   :  { %1382 = vmatmul.mubr.bf16.vlgmr.msra.gmra.mrb[0].mxu0 %v58_v21  ;;  %1554 = vmatmul.mubr.bf16.vlgmr.msra.gmra.mrb[0].mxu1 %v58_v21 }
  0xc3   :  { %1393 = vmatpush1.bf16.msra.mxu0 %v5335_v19  ;;  %1565 = vmatpush1.bf16.msra.mxu1 %v5338_v20 }
  0xc4   :  { %1424 = vmatprep.mubr.bf16.mxu0 %v5913_v23  ;;  %1596 = vmatprep.mubr.bf16.mxu1 %v5913_v23 }
  0xc5   :  { %2015 = vmatprep.subr.bf16.mxu0 %v5343_v22 }
  0xce   :  { %4580 = vmatmul.mubr.msk.bf16.vlgmr.msra.gmra.mrb[0].mxu0 %vm1259_vm0, %v60_v27  ;;  %4581 = vmatmul.mubr.msk.bf16.vlgmr.msra.gmra.mrb[0].mxu1 %vm1259_vm0, %v60_v27 }
  0xcf   :  { %2016 = vmatpush1.bf16.msra.mxu0 %v5341_v26  ;;  %2364 = vmatprep.mubr.bf16.mxu1 %v5913_v23 }
  0xd0   :  { %2017 = vmatprep.subr.bf16.mxu0 %v5346_v28 }
  0xd3   :  { %2018 = vmatpush1.bf16.msra.mxu0 %v5344_v29 }
  0xd4   :  { %2019 = vmatprep.subr.bf16.mxu0 %v5349_v30 }
  0xd7   :  { %2020 = vmatpush1.bf16.msra.mxu0 %v5347_v31 }
  0xd8   :  { %2021 = vmatprep.subr.bf16.mxu0 %v5352_v32 }
  0xdb   :  { %2022 = vmatpush1.bf16.msra.mxu0 %v5350_v33 }
  0xdc   :  { %2023 = vmatprep.subr.bf16.mxu0 %v5355_v34 }
  0xdf   :  { %2024 = vmatpush1.bf16.msra.mxu0 %v5353_v35 }
  0xe0   :  { %2025 = vmatprep.subr.bf16.mxu0 %v5358_v36 }
  0xe3   :  { %2026 = vmatpush1.bf16.msra.mxu0 %v5356_v37 }
  0xe4   :  { %2027 = vmatprep.subr.bf16.mxu0 %v5361_v38 }
  0xe7   :  { %2028 = vmatpush1.bf16.msra.mxu0 %v5359_v39 }
  0xe8   :  { %2029 = vmatprep.subr.bf16.mxu0 %v5364_v40 }
  0xeb   :  { %2030 = vmatpush1.bf16.msra.mxu0 %v5362_v41 }
  0xec   :  { %2031 = vmatprep.subr.bf16.mxu0 %v5367_v42 }
  0xef   :  { %2032 = vmatpush1.bf16.msra.mxu0 %v5365_v43 }
  0xf0   :  { %2033 = vmatprep.subr.bf16.mxu0 %v5370_v44 }
  0xf3   :  { %2034 = vmatpush1.bf16.msra.mxu0 %v5368_v45 }
  0xf4   :  { %2035 = vmatprep.subr.bf16.mxu0 %v5373_v46 }
  0xf7   :  { %2036 = vmatpush1.bf16.msra.mxu0 %v5371_v47 }
  0xf8   :  { %2037 = vmatprep.subr.bf16.mxu0 %v5376_v48 }
  0xfb   :  { %2038 = vmatpush1.bf16.msra.mxu0 %v5374_v49 }
  0xfc   :  { %2039 = vmatprep.subr.bf16.mxu0 %v5379_v50 }
  0xff   :  { %2040 = vmatpush1.bf16.msra.mxu0 %v5377_v51 }
 0x100   :  { %2041 = vmatprep.subr.bf16.mxu0 %v5382_v52 }
 0x103   :  { %2042 = vmatpush1.bf16.msra.mxu0 %v5380_v53 }
 0x104   :  { %18 = vsyncpa [#allocation5], 0  ;;  %v5385_v54 = vld [vmem:[%s7693_s4 + $0xe4] ss:$8 sps:$4 sm:$0xff]   ;;  %v5383_v55 = vld [vmem:[%s7693_s4 + $0xe0] ss:$8 sps:$4 sm:$0xff]   ;;  %v259_v63 = vlaneseq }
 0x105   :  { %2043 = vmatprep.subr.bf16.mxu0 %v5385_v54  ;;  %v5388_v56 = vld [vmem:[%s7693_s4 + $0xf4] ss:$8 sps:$4 sm:$0xff]   ;;  %v5386_v57 = vld [vmem:[%s7693_s4 + $0xf0] ss:$8 sps:$4 sm:$0xff]   ;;  %v5391_v58 = vld [vmem:[%s7693_s4 + $0x104] ss:$8 sps:$4 sm:$0xff]  }
 0x106   :  { %v5437_v59 = vld [vmem:[%s7695_s6] ss:$16 sps:$4 sm:$0xff]   ;;  %v5439_v60 = vld [vmem:[%s7695_s6 + $0x4] ss:$16 sps:$4 sm:$0xff]   ;;  %v6724_v0 = vshrl.u32 %v259_v63, 7 }
 0x107   :  { %2044 = vmatpush1.bf16.msra.mxu0 %v5383_v55  ;;  %v5442_v61 = vld [vmem:[%s7695_s6 + $0x24] ss:$16 sps:$4 sm:$0xff]   ;;  %2332 = vmatprep.subr.bf16.mxu1 %v5439_v60  ;;  %v5440_v62 = vld [vmem:[%s7695_s6 + $0x20] ss:$16 sps:$4 sm:$0xff]  }
 0x108   :  { %2045 = vmatprep.subr.bf16.mxu0 %v5388_v56  ;;  %2333 = vmatpush1.bf16.msra.mxu1 %v5437_v59  ;;  %v6727_v1 = vsub.s32 0, %v6724_v0  ;;  %v6730_v2 = vsub.s32 2, %v6724_v0  ;;  %v257_v3 = vld [vmem:[%s7692_s3] sm:$0xf]  ;;  %v6736_v4 = vsub.s32 1, %v6724_v0  ;;  %v6739_v5 = vsub.s32 3, %v6724_v0 }
 0x109   :  { %2334 = vmatprep.subr.bf16.mxu1 %v5442_v61  ;;  %v5389_v39 = vld [vmem:[%s7693_s4 + $0x100] ss:$8 sps:$4 sm:$0xff]   ;;  %v5394_v40 = vld [vmem:[%s7693_s4 + $0x114] ss:$8 sps:$4 sm:$0xff]   ;;  %v5392_v41 = vld [vmem:[%s7693_s4 + $0x110] ss:$8 sps:$4 sm:$0xff]  }
 0x10a   :  { %v262_v6 = vrot.slane %v257_v3, %v6727_v1  ;;  %v270_v7 = vrot.slane %v257_v3, %v6730_v2  ;;  %v266_v8 = vrot.slane %v257_v3, %v6736_v4  ;;  %v274_v9 = vrot.slane %v257_v3, %v6739_v5  ;;  %v5397_v42 = vld [vmem:[%s7693_s4 + $0x124] ss:$8 sps:$4 sm:$0xff]   ;;  %v5395_v43 = vld [vmem:[%s7693_s4 + $0x120] ss:$8 sps:$4 sm:$0xff]   ;;  %v5400_v44 = vld [vmem:[%s7693_s4 + $0x134] ss:$8 sps:$4 sm:$0xff]  }
 0x10b   :  { %2046 = vmatpush1.bf16.msra.mxu0 %v5386_v57  ;;  %v5398_v45 = vld [vmem:[%s7693_s4 + $0x130] ss:$8 sps:$4 sm:$0xff]   ;;  %v5403_v46 = vld [vmem:[%s7693_s4 + $0x144] ss:$8 sps:$4 sm:$0xff]   ;;  %v5401_v47 = vld [vmem:[%s7693_s4 + $0x140] ss:$8 sps:$4 sm:$0xff]  }
 0x10c   :  { %2058 = vmatprep.subr.bf16.mxu0 %v5391_v58  ;;  %2335 = vmatpush1.bf16.msra.mxu1 %v5440_v62  ;;  %v5406_v48 = vld [vmem:[%s7693_s4 + $0x154] ss:$8 sps:$4 sm:$0xff]   ;;  %v5404_v49 = vld [vmem:[%s7693_s4 + $0x150] ss:$8 sps:$4 sm:$0xff]   ;;  %v5409_v50 = vld [vmem:[%s7693_s4 + $0x164] ss:$8 sps:$4 sm:$0xff]  }
 0x10d   :  { %v5407_v51 = vld [vmem:[%s7693_s4 + $0x160] ss:$8 sps:$4 sm:$0xff]   ;;  %v5412_v52 = vld [vmem:[%s7693_s4 + $0x174] ss:$8 sps:$4 sm:$0xff]   ;;  %v5410_v53 = vld [vmem:[%s7693_s4 + $0x170] ss:$8 sps:$4 sm:$0xff]  }
 0x10e   :  { %v5415_v54 = vld [vmem:[%s7693_s4 + $0x184] ss:$8 sps:$4 sm:$0xff]   ;;  %v5413_v55 = vld [vmem:[%s7693_s4 + $0x180] ss:$8 sps:$4 sm:$0xff]   ;;  %v5418_v56 = vld [vmem:[%s7693_s4 + $0x194] ss:$8 sps:$4 sm:$0xff]  }
 0x10f   :  { %v5416_v57 = vld [vmem:[%s7693_s4 + $0x190] ss:$8 sps:$4 sm:$0xff]   ;;  %v5421_v58 = vld [vmem:[%s7693_s4 + $0x1a4] ss:$8 sps:$4 sm:$0xff]   ;;  %v5419_v59 = vld [vmem:[%s7693_s4 + $0x1a0] ss:$8 sps:$4 sm:$0xff]  }
 0x110   :  { %v5424_v60 = vld [vmem:[%s7693_s4 + $0x1b4] ss:$8 sps:$4 sm:$0xff]   ;;  %v5422_v61 = vld [vmem:[%s7693_s4 + $0x1b0] ss:$8 sps:$4 sm:$0xff]   ;;  %v5427_v62 = vld [vmem:[%s7693_s4 + $0x1c4] ss:$8 sps:$4 sm:$0xff]  }
 0x111   :  { %v5425_v63 = vld [vmem:[%s7693_s4 + $0x1c0] ss:$8 sps:$4 sm:$0xff]   ;;  %v5430_v3 = vld [vmem:[%s7693_s4 + $0x1d4] ss:$8 sps:$4 sm:$0xff]  }
 0x1a1   :  { %v1426_v10 = vpop.f32.mrb[0].mxu0  ;;  %v1598_v11 = vpop.f32.mrb[0].mxu1 }
 0x1a2   :  { %v4976_v12 = vadd.f32 %v1426_v10, %v262_v6  ;;  %v4980_v13 = vadd.f32 %v1598_v11, %v270_v7  ;;  %v1428_v14 = vpop.f32.mrb[1].mxu0  ;;  %v1600_v15 = vpop.f32.mrb[1].mxu1  ;;  %v5434_v10 = vld [vmem:[%s7693_s4 + $0x1f0] ss:$8 sps:$4 sm:$0xff]   ;;  %v5445_v11 = vld [vmem:[%s7695_s6 + $0x44] ss:$16 sps:$4 sm:$0xff]  }
 0x1a3   :  { %v4977_v16 = vadd.f32 %v1428_v14, %v266_v8  ;;  %v4981_v17 = vadd.f32 %v1600_v15, %v274_v9  ;;  %v1430_v18 = vpop.f32.mrb[2].mxu0  ;;  %v1602_v19 = vpop.f32.mrb[2].mxu1  ;;  %2336 = vmatprep.subr.bf16.mxu1 %v5445_v11  ;;  %v5446_v14 = vld [vmem:[%s7695_s6 + $0x60] ss:$16 sps:$4 sm:$0xff]   ;;  %v5451_v15 = vld [vmem:[%s7695_s6 + $0x84] ss:$16 sps:$4 sm:$0xff]  }
 0x1a4   :  { %v4978_v20 = vadd.f32 %v1430_v18, %v262_v6  ;;  %v4982_v21 = vadd.f32 %v1602_v19, %v270_v7  ;;  %v1432_v22 = vpop.f32.mrb[3].mxu0  ;;  %v1604_v24 = vpop.f32.mrb[3].mxu1  ;;  %v1607_v27 = vmax.f32 %v4976_v12, 0.0  ;;  %v1609_v28 = vmax.f32 %v4980_v13, 0.0  ;;  %v5428_v6 = vld [vmem:[%s7693_s4 + $0x1d0] ss:$8 sps:$4 sm:$0xff]  }
 0x1a5   :  { %v4979_v25 = vadd.f32 %v1432_v22, %v266_v8  ;;  %v4983_v26 = vadd.f32 %v1604_v24, %v274_v9  ;;  %v1608_v31 = vmax.f32 %v4977_v16, 0.0  ;;  %v1610_v32 = vmax.f32 %v4981_v17, 0.0  ;;  %v5433_v7 = vld [vmem:[%s7693_s4 + $0x1e4] ss:$8 sps:$4 sm:$0xff]   ;;  %v5431_v8 = vld [vmem:[%s7693_s4 + $0x1e0] ss:$8 sps:$4 sm:$0xff]  }
 0x1a6   :  { %v1611_v29 = vmax.f32 %v4978_v20, 0.0  ;;  %v1613_v30 = vmax.f32 %v4982_v21, 0.0  ;;  %v5436_v9 = vld [vmem:[%s7693_s4 + $0x1f4] ss:$8 sps:$4 sm:$0xff]   ;;  %v5443_v12 = vld [vmem:[%s7695_s6 + $0x40] ss:$16 sps:$4 sm:$0xff]  }
 0x1a7   :  { %v1612_v33 = vmax.f32 %v4979_v25, 0.0  ;;  %v1614_v34 = vmax.f32 %v4983_v26, 0.0  ;;  %2337 = vmatpush1.bf16.msra.mxu1 %v5443_v12  ;;  %v5448_v13 = vld [vmem:[%s7695_s6 + $0x64] ss:$16 sps:$4 sm:$0xff]   ;;  %v5449_v16 = vld [vmem:[%s7695_s6 + $0x80] ss:$16 sps:$4 sm:$0xff]  }
 0x1a8   :  { %v1615_v35 = vpack.c.bf16 %v1611_v29, %v1607_v27  ;;  %v6745_v36 = vpack.c.bf16 %v1613_v30, %v1609_v28  ;;  %2338 = vmatprep.subr.bf16.mxu1 %v5448_v13  ;;  %v5454_v17 = vld [vmem:[%s7695_s6 + $0xa4] ss:$16 sps:$4 sm:$0xff]   ;;  %v5452_v18 = vld [vmem:[%s7695_s6 + $0xa0] ss:$16 sps:$4 sm:$0xff]   ;;  %v5463_v24 = vld [vmem:[%s7695_s6 + $0xc] ss:$16 sps:$4 sm:$0xff]  }
 0x1a9   :  { %v1616_v37 = vpack.c.bf16 %v1612_v33, %v1608_v31  ;;  %v1618_v38 = vpack.c.bf16 %v1614_v34, %v1610_v32  ;;  %v5457_v19 = vld [vmem:[%s7695_s6 + $0xc4] ss:$16 sps:$4 sm:$0xff]   ;;  %v5455_v20 = vld [vmem:[%s7695_s6 + $0xc0] ss:$16 sps:$4 sm:$0xff]   ;;  %v5490_v26 = vld [vmem:[%s7697_s8 + $0xc] ss:$28 sps:$4 sm:$0xff]  }
 0x1aa   :  { %v5460_v21 = vld [vmem:[%s7695_s6 + $0xe4] ss:$16 sps:$4 sm:$0xff]   ;;  %v5458_v22 = vld [vmem:[%s7695_s6 + $0xe0] ss:$16 sps:$4 sm:$0xff]   ;;  %v5502_v29 = vld [vmem:[%s7697_s8 + $0x7c] ss:$28 sps:$4 sm:$0xff]  }
 0x1ab   :  { %2047 = vmatprep.mubr.bf16.mxu0 %v1616_v37  ;;  %2339 = vmatpush1.bf16.msra.mxu1 %v5446_v14  ;;  %v5488_v25 = vld [vmem:[%s7697_s8 + $0x8] ss:$28 sps:$4 sm:$0xff]   ;;  %v5494_v28 = vld [vmem:[%s7697_s8 + $0x40] ss:$28 sps:$4 sm:$0xff]   ;;  %v5500_v30 = vld [vmem:[%s7697_s8 + $0x78] ss:$28 sps:$4 sm:$0xff]  }
 0x1ac   :  { %2048 = vmatmul.mubr.bf16.vlgmr.msra.gmra.mrb[4].mxu0 %v1615_v35  ;;  %2340 = vmatprep.subr.bf16.mxu1 %v5451_v15  ;;  %v5496_v27 = vld [vmem:[%s7697_s8 + $0x44] ss:$28 sps:$4 sm:$0xff]   ;;  %v5508_v31 = vld [vmem:[%s7697_s8 + $0xb4] ss:$28 sps:$4 sm:$0xff]   ;;  %v5514_v33 = vld [vmem:[%s7697_s8 + $0xec] ss:$28 sps:$4 sm:$0xff]  }
 0x1ad   :  { %2059 = vmatpush1.bf16.msra.mxu0 %v5389_v39  ;;  %2090 = vmatprep.mubr.bf16.mxu0 %v1618_v38  ;;  %v5506_v32 = vld [vmem:[%s7697_s8 + $0xb0] ss:$28 sps:$4 sm:$0xff]   ;;  %v5512_v34 = vld [vmem:[%s7697_s8 + $0xe8] ss:$28 sps:$4 sm:$0xff]   ;;  %v5526_v37 = vld [vmem:[%s7697_s8 + $0x15c] ss:$28 sps:$4 sm:$0xff]  }
 0x1ae   :  { %2060 = vmatprep.subr.bf16.mxu0 %v5394_v40  ;;  %v5520_v35 = vld [vmem:[%s7697_s8 + $0x124] ss:$28 sps:$4 sm:$0xff]   ;;  %v5524_v38 = vld [vmem:[%s7697_s8 + $0x158] ss:$28 sps:$4 sm:$0xff]   ;;  %v5530_v40 = vld [vmem:[%s7697_s8 + $0x190] ss:$28 sps:$4 sm:$0xff]  }
 0x1af   :  { %2341 = vmatpush1.bf16.msra.mxu1 %v5449_v16  ;;  %v5532_v39 = vld [vmem:[%s7697_s8 + $0x194] ss:$28 sps:$4 sm:$0xff]   ;;  %v2106_v11 = vld [vmem:[%s7690_s1 + $0x8] sm:$0xff] }
 0x1b0   :  { %2342 = vmatprep.subr.bf16.mxu1 %v5454_v17  ;;  %v5461_v17 = vld [vmem:[%s7695_s6 + $0x8] ss:$16 sps:$4 sm:$0xff]  }
 0x1b1   :  { %2061 = vmatpush1.bf16.msra.mxu0 %v5392_v41  ;;  %v5538_v41 = vld [vmem:[%s7697_s8 + $0x1cc] ss:$28 sps:$4 sm:$0xff]  }
 0x1b2   :  { %2062 = vmatprep.subr.bf16.mxu0 %v5397_v42  ;;  %v5536_v42 = vld [vmem:[%s7697_s8 + $0x1c8] ss:$28 sps:$4 sm:$0xff]  }
 0x1b3   :  { %2343 = vmatpush1.bf16.msra.mxu1 %v5452_v18 }
 0x1b4   :  { %2344 = vmatprep.subr.bf16.mxu1 %v5457_v19  ;;  %v5466_v19 = vld [vmem:[%s7695_s6 + $0x2c] ss:$16 sps:$4 sm:$0xff]  }
 0x1b5   :  { %2063 = vmatpush1.bf16.msra.mxu0 %v5395_v43  ;;  %v5544_v43 = vld [vmem:[%s7697_s8 + $0x204] ss:$28 sps:$4 sm:$0xff]  }
 0x1b6   :  { %2064 = vmatprep.subr.bf16.mxu0 %v5400_v44  ;;  %v5542_v44 = vld [vmem:[%s7697_s8 + $0x200] ss:$28 sps:$4 sm:$0xff]  }
 0x1b7   :  { %2345 = vmatpush1.bf16.msra.mxu1 %v5455_v20  ;;  %v5464_v20 = vld [vmem:[%s7695_s6 + $0x28] ss:$16 sps:$4 sm:$0xff]  }
 0x1b8   :  { %2346 = vmatprep.subr.bf16.mxu1 %v5460_v21  ;;  %v5469_v21 = vld [vmem:[%s7695_s6 + $0x4c] ss:$16 sps:$4 sm:$0xff]  }
 0x1b9   :  { %2065 = vmatpush1.bf16.msra.mxu0 %v5398_v45  ;;  %v5550_v45 = vld [vmem:[%s7697_s8 + $0x23c] ss:$28 sps:$4 sm:$0xff]  }
 0x1ba   :  { %2066 = vmatprep.subr.bf16.mxu0 %v5403_v46  ;;  %v5548_v46 = vld [vmem:[%s7697_s8 + $0x238] ss:$28 sps:$4 sm:$0xff]  }
 0x1bb   :  { %2347 = vmatpush1.bf16.msra.mxu1 %v5458_v22  ;;  %v5467_v22 = vld [vmem:[%s7695_s6 + $0x48] ss:$16 sps:$4 sm:$0xff]  }
 0x1bc   :  { %2375 = vmatprep.subr.bf16.mxu1 %v5463_v24  ;;  %v5472_v24 = vld [vmem:[%s7695_s6 + $0x6c] ss:$16 sps:$4 sm:$0xff]  }
 0x1bd   :  { %2067 = vmatpush1.bf16.msra.mxu0 %v5401_v47  ;;  %v5556_v47 = vld [vmem:[%s7697_s8 + $0x274] ss:$28 sps:$4 sm:$0xff]  }
 0x1be   :  { %2068 = vmatprep.subr.bf16.mxu0 %v5406_v48  ;;  %v5554_v48 = vld [vmem:[%s7697_s8 + $0x270] ss:$28 sps:$4 sm:$0xff]  }
 0x1c1   :  { %2069 = vmatpush1.bf16.msra.mxu0 %v5404_v49  ;;  %v5562_v49 = vld [vmem:[%s7697_s8 + $0x2ac] ss:$28 sps:$4 sm:$0xff]  }
 0x1c2   :  { %2070 = vmatprep.subr.bf16.mxu0 %v5409_v50  ;;  %v5560_v50 = vld [vmem:[%s7697_s8 + $0x2a8] ss:$28 sps:$4 sm:$0xff]  }
 0x1c5   :  { %2071 = vmatpush1.bf16.msra.mxu0 %v5407_v51  ;;  %v5568_v51 = vld [vmem:[%s7697_s8 + $0x2e4] ss:$28 sps:$4 sm:$0xff]  }
 0x1c6   :  { %2072 = vmatprep.subr.bf16.mxu0 %v5412_v52  ;;  %v5566_v52 = vld [vmem:[%s7697_s8 + $0x2e0] ss:$28 sps:$4 sm:$0xff]  }
 0x1c9   :  { %2073 = vmatpush1.bf16.msra.mxu0 %v5410_v53  ;;  %v1683_v53 = vld [vmem:[%s7694_s5] sm:$0x3] }
 0x1ca   :  { %2074 = vmatprep.subr.bf16.mxu0 %v5415_v54  ;;  %v1688_v54 = vrot.slane %v1683_v53, %v6727_v1 }
 0x1cd   :  { %2075 = vmatpush1.bf16.msra.mxu0 %v5413_v55  ;;  %v1692_v55 = vrot.slane %v1683_v53, %v6736_v4  ;;  %v5547_v53 = vld [vmem:[%s7697_s8 + $0x234] ss:$28 sps:$4 sm:$0xff]  }
 0x1ce   :  { %2076 = vmatprep.subr.bf16.mxu0 %v5418_v56 }
 0x1d1   :  { %2077 = vmatpush1.bf16.msra.mxu0 %v5416_v57 }
 0x1d2   :  { %2078 = vmatprep.subr.bf16.mxu0 %v5421_v58 }
 0x1d5   :  { %2079 = vmatpush1.bf16.msra.mxu0 %v5419_v59 }
 0x1d6   :  { %2080 = vmatprep.subr.bf16.mxu0 %v5424_v60 }
 0x1d9   :  { %2081 = vmatpush1.bf16.msra.mxu0 %v5422_v61 }
 0x1da   :  { %2082 = vmatprep.subr.bf16.mxu0 %v5427_v62 }
 0x1dd   :  { %2083 = vmatpush1.bf16.msra.mxu0 %v5425_v63 }
 0x1de   :  { %2084 = vmatprep.subr.bf16.mxu0 %v5430_v3 }
 0x1e1   :  { %2085 = vmatpush1.bf16.msra.mxu0 %v5428_v6 }
 0x1e2   :  { %2086 = vmatprep.subr.bf16.mxu0 %v5433_v7 }
 0x1e5   :  { %2087 = vmatpush1.bf16.msra.mxu0 %v5431_v8 }
 0x1e6   :  { %2088 = vmatprep.subr.bf16.mxu0 %v5436_v9  ;;  %v2105_v9 = vld [vmem:[%s7690_s1] sm:$0xff] }
 0x1e9   :  { %2089 = vmatpush1.bf16.msra.mxu0 %v5434_v10 }
 0x1ea   :  { %3961 = vmatprep.subr.bf16.mxu0 %v5490_v26  ;;  %v5473_v26 = vld [vmem:[%s7695_s6 + $0x88] ss:$16 sps:$4 sm:$0xff]  }
 0x1ec   :  { %2091 = vmatmul.mubr.bf16.vlgmr.msra.gmra.mrb[4].mxu0 %v6745_v36  ;;  %v5518_v36 = vld [vmem:[%s7697_s8 + $0x120] ss:$28 sps:$4 sm:$0xff]  }
 0x1ed   :  { %3962 = vmatpush1.bf16.msra.mxu0 %v5488_v25  ;;  %v5475_v25 = vld [vmem:[%s7695_s6 + $0x8c] ss:$16 sps:$4 sm:$0xff]  }
 0x1ee   :  { %3963 = vmatprep.subr.bf16.mxu0 %v5496_v27  ;;  %v5478_v27 = vld [vmem:[%s7695_s6 + $0xac] ss:$16 sps:$4 sm:$0xff]  }
 0x1f1   :  { %3964 = vmatpush1.bf16.msra.mxu0 %v5494_v28  ;;  %v5476_v28 = vld [vmem:[%s7695_s6 + $0xa8] ss:$16 sps:$4 sm:$0xff]  }
 0x1f2   :  { %3965 = vmatprep.subr.bf16.mxu0 %v5502_v29  ;;  %v5481_v29 = vld [vmem:[%s7695_s6 + $0xcc] ss:$16 sps:$4 sm:$0xff]  }
 0x1f5   :  { %3966 = vmatpush1.bf16.msra.mxu0 %v5500_v30  ;;  %v5479_v30 = vld [vmem:[%s7695_s6 + $0xc8] ss:$16 sps:$4 sm:$0xff]  }
 0x1f6   :  { %3967 = vmatprep.subr.bf16.mxu0 %v5508_v31  ;;  %v5484_v31 = vld [vmem:[%s7695_s6 + $0xec] ss:$16 sps:$4 sm:$0xff]  }
 0x1f9   :  { %3968 = vmatpush1.bf16.msra.mxu0 %v5506_v32  ;;  %v5482_v32 = vld [vmem:[%s7695_s6 + $0xe8] ss:$16 sps:$4 sm:$0xff]  }
 0x1fa   :  { %3969 = vmatprep.subr.bf16.mxu0 %v5514_v33  ;;  %v5487_v33 = vld [vmem:[%s7697_s8 + $0x4] ss:$28 sps:$4 sm:$0xff]  }
 0x1fd   :  { %3970 = vmatpush1.bf16.msra.mxu0 %v5512_v34  ;;  %v5485_v34 = vld [vmem:[%s7697_s8] ss:$28 sps:$4 sm:$0xff]  }
 0x1fe   :  { %3971 = vmatprep.subr.bf16.mxu0 %v5520_v35  ;;  %v5493_v35 = vld [vmem:[%s7697_s8 + $0x3c] ss:$28 sps:$4 sm:$0xff]  }
 0x201   :  { %3972 = vmatpush1.bf16.msra.mxu0 %v5518_v36  ;;  %v5491_v36 = vld [vmem:[%s7697_s8 + $0x38] ss:$28 sps:$4 sm:$0xff]  }
 0x202   :  { %3973 = vmatprep.subr.bf16.mxu0 %v5526_v37  ;;  %v5499_v37 = vld [vmem:[%s7697_s8 + $0x74] ss:$28 sps:$4 sm:$0xff]  }
 0x205   :  { %3974 = vmatpush1.bf16.msra.mxu0 %v5524_v38  ;;  %v5497_v38 = vld [vmem:[%s7697_s8 + $0x70] ss:$28 sps:$4 sm:$0xff]  }
 0x206   :  { %3975 = vmatprep.subr.bf16.mxu0 %v5532_v39  ;;  %v5505_v39 = vld [vmem:[%s7697_s8 + $0xac] ss:$28 sps:$4 sm:$0xff]  }
 0x209   :  { %3976 = vmatpush1.bf16.msra.mxu0 %v5530_v40  ;;  %v5503_v40 = vld [vmem:[%s7697_s8 + $0xa8] ss:$28 sps:$4 sm:$0xff]  }
 0x20a   :  { %3977 = vmatprep.subr.bf16.mxu0 %v5538_v41  ;;  %v5511_v41 = vld [vmem:[%s7697_s8 + $0xe4] ss:$28 sps:$4 sm:$0xff]  }
 0x20d   :  { %3978 = vmatpush1.bf16.msra.mxu0 %v5536_v42  ;;  %v5509_v42 = vld [vmem:[%s7697_s8 + $0xe0] ss:$28 sps:$4 sm:$0xff]  }
 0x20e   :  { %3979 = vmatprep.subr.bf16.mxu0 %v5544_v43  ;;  %v5517_v43 = vld [vmem:[%s7697_s8 + $0x11c] ss:$28 sps:$4 sm:$0xff]  }
 0x211   :  { %3980 = vmatpush1.bf16.msra.mxu0 %v5542_v44  ;;  %v5515_v44 = vld [vmem:[%s7697_s8 + $0x118] ss:$28 sps:$4 sm:$0xff]  }
 0x212   :  { %3981 = vmatprep.subr.bf16.mxu0 %v5550_v45  ;;  %v5523_v45 = vld [vmem:[%s7697_s8 + $0x154] ss:$28 sps:$4 sm:$0xff]  }
 0x215   :  { %3982 = vmatpush1.bf16.msra.mxu0 %v5548_v46  ;;  %v5521_v46 = vld [vmem:[%s7697_s8 + $0x150] ss:$28 sps:$4 sm:$0xff]  }
 0x216   :  { %3983 = vmatprep.subr.bf16.mxu0 %v5556_v47  ;;  %v5529_v47 = vld [vmem:[%s7697_s8 + $0x18c] ss:$28 sps:$4 sm:$0xff]  }
 0x219   :  { %3984 = vmatpush1.bf16.msra.mxu0 %v5554_v48  ;;  %v5527_v48 = vld [vmem:[%s7697_s8 + $0x188] ss:$28 sps:$4 sm:$0xff]  }
 0x21a   :  { %3985 = vmatprep.subr.bf16.mxu0 %v5562_v49  ;;  %v5535_v49 = vld [vmem:[%s7697_s8 + $0x1c4] ss:$28 sps:$4 sm:$0xff]  }
 0x21d   :  { %3986 = vmatpush1.bf16.msra.mxu0 %v5560_v50  ;;  %v5533_v50 = vld [vmem:[%s7697_s8 + $0x1c0] ss:$28 sps:$4 sm:$0xff]  }
 0x21e   :  { %3987 = vmatprep.subr.bf16.mxu0 %v5568_v51  ;;  %v5541_v51 = vld [vmem:[%s7697_s8 + $0x1fc] ss:$28 sps:$4 sm:$0xff]  }
 0x221   :  { %3988 = vmatpush1.bf16.msra.mxu0 %v5566_v52  ;;  %v5539_v52 = vld [vmem:[%s7697_s8 + $0x1f8] ss:$28 sps:$4 sm:$0xff]  }
 0x2bf   :  { %v2092_v56 = vpop.f32.mrb[4].mxu0 }
 0x2c0   :  { %v4984_v57 = vadd.f32 %v2092_v56, %v1688_v54  ;;  %v2094_v58 = vpop.f32.mrb[5].mxu0  ;;  %v5551_v56 = vld [vmem:[%s7697_s8 + $0x268] ss:$28 sps:$4 sm:$0xff]  }
 0x2c1   :  { %v4985_v59 = vadd.f32 %v2094_v58, %v1692_v55  ;;  %v2096_v60 = vpop.f32.mrb[6].mxu0  ;;  %v5557_v58 = vld [vmem:[%s7697_s8 + $0x2a0] ss:$28 sps:$4 sm:$0xff]  }
 0x2c2   :  { %2101 = vst [vmem:[#allocation4] sm:$0xff] %v4984_v57  ;;  %v4986_v61 = vadd.f32 %v2096_v60, %v1688_v54  ;;  %v2098_v62 = vpop.f32.mrb[7].mxu0  ;;  %v5545_v54 = vld [vmem:[%s7697_s8 + $0x230] ss:$28 sps:$4 sm:$0xff]   ;;  %v5563_v60 = vld [vmem:[%s7697_s8 + $0x2d8] ss:$28 sps:$4 sm:$0xff]  }
 0x2c3   :  { %2102 = vst [vmem:[#allocation4 + $0x8] sm:$0xff] %v4985_v59  ;;  %v2107_v63 = vmul.f32 0.5, %v4985_v59  ;;  %v4987_v3 = vadd.f32 %v2098_v62, %v1692_v55  ;;  %v5553_v55 = vld [vmem:[%s7697_s8 + $0x26c] ss:$28 sps:$4 sm:$0xff]   ;;  %v5565_v59 = vld [vmem:[%s7697_s8 + $0x2dc] ss:$28 sps:$4 sm:$0xff]  }
 0x2c4   :  { %2103 = vst [vmem:[#allocation4 + $0x10] sm:$0xff] %v4986_v61  ;;  %v5574_v62 = vld [vmem:[%s7697_s8 + $0x31c] ss:$28 sps:$4 sm:$0xff]  }
 0x2c5   :  { %v2109_v6 = vmul.f32 1.442695, %v2107_v63  ;;  %2104 = vst [vmem:[#allocation4 + $0x18] sm:$0xff] %v4987_v3  ;;  %v2108_v7 = vmul.f32 0.5, %v4987_v3  ;;  %v5569_v63 = vld [vmem:[%s7697_s8 + $0x310] ss:$28 sps:$4 sm:$0xff]   ;;  %3989 = vmatprep.subr.bf16.mxu0 %v5574_v62 }
 0x2c6   :  { %v5572_v3 = vld [vmem:[%s7697_s8 + $0x318] ss:$28 sps:$4 sm:$0xff]  }
 0x2c7   :  { %5805 = vpow2.f32 %v2109_v6  ;;  %v2111_v8 = vmul.f32 1.442695, %v2108_v7  ;;  %3990 = vmatpush1.bf16.msra.mxu0 %v5572_v3  ;;  %v5577_v6 = vld [vmem:[%s7697_s8 + $0x34c] ss:$28 sps:$4 sm:$0xff]   ;;  %v5580_v7 = vld [vmem:[%s7697_s8 + $0x354] ss:$28 sps:$4 sm:$0xff]  }
 0x2c8   :  { %3991 = vmatprep.subr.bf16.mxu0 %v5580_v7 }
 0x2c9   :  { %5807 = vpow2.f32 %v2111_v8  ;;  %v5575_v8 = vld [vmem:[%s7697_s8 + $0x348] ss:$28 sps:$4 sm:$0xff]  }
 0x2d1   :  { %v5806_v10 = vpop.eup %5805 }
 0x2d2   :  { %v2113_v12 = vmul.f32 %v5806_v10, %v2105_v9  ;;  %v5578_v9 = vld [vmem:[%s7697_s8 + $0x350] ss:$28 sps:$4 sm:$0xff]   ;;  %v5583_v10 = vld [vmem:[%s7697_s8 + $0x384] ss:$28 sps:$4 sm:$0xff]  }
 0x2d3   :  { %v5808_v13 = vpop.eup %5807  ;;  %3992 = vmatpush1.bf16.msra.mxu0 %v5578_v9  ;;  %v5626_v9 = vld [vmem:[%s7697_s8 + $0x510] ss:$28 sps:$4 sm:$0xff]  }
 0x2d4   :  { %v2114_v14 = vmul.f32 %v5808_v13, %v2106_v11  ;;  %v2115_v15 = vadd.f32 %v4984_v57, %v2113_v12  ;;  %v5559_v57 = vld [vmem:[%s7697_s8 + $0x2a4] ss:$28 sps:$4 sm:$0xff]   ;;  %v5586_v11 = vld [vmem:[%s7697_s8 + $0x38c] ss:$28 sps:$4 sm:$0xff]  }
 0x2d5   :  { %4004 = vmatprep.subr.bf16.mxu0 %v5586_v11  ;;  %v7138_v12 = vld [vmem:[%s7696_s7] sm:$0xf] }
 0x2d6   :  { %v2116_v16 = vadd.f32 %v4986_v61, %v2114_v14  ;;  %v5571_v61 = vld [vmem:[%s7697_s8 + $0x314] ss:$28 sps:$4 sm:$0xff]   ;;  %v2155_v13 = vrot.slane %v7138_v12, %v6727_v1  ;;  %v2159_v14 = vrot.slane %v7138_v12, %v6736_v4 }
 0x2d8   :  { %v2117_v18 = vpack.c.bf16 %v2116_v16, %v2115_v15 }
 0x2da   :  { %2365 = vmatmul.mubr.bf16.vlgmr.msra.gmra.mrb[4].mxu1 %v2117_v18 }
 0x2db   :  { %2376 = vmatpush1.bf16.msra.mxu1 %v5461_v17  ;;  %2407 = vmatprep.mubr.bf16.mxu1 %v5913_v23  ;;  %v5470_v23 = vld [vmem:[%s7695_s6 + $0x68] ss:$16 sps:$4 sm:$0xff]  }
 0x2dc   :  { %2377 = vmatprep.subr.bf16.mxu1 %v5466_v19 }
 0x2df   :  { %2378 = vmatpush1.bf16.msra.mxu1 %v5464_v20 }
 0x2e0   :  { %2379 = vmatprep.subr.bf16.mxu1 %v5469_v21 }
 0x2e3   :  { %2380 = vmatpush1.bf16.msra.mxu1 %v5467_v22 }
 0x2e4   :  { %2381 = vmatprep.subr.bf16.mxu1 %v5472_v24 }
 0x2e7   :  { %2382 = vmatpush1.bf16.msra.mxu1 %v5470_v23 }
 0x2e8   :  { %2383 = vmatprep.subr.bf16.mxu1 %v5475_v25 }
 0x2eb   :  { %2384 = vmatpush1.bf16.msra.mxu1 %v5473_v26 }
 0x2ec   :  { %2385 = vmatprep.subr.bf16.mxu1 %v5478_v27 }
 0x2ef   :  { %2386 = vmatpush1.bf16.msra.mxu1 %v5476_v28 }
 0x2f0   :  { %2387 = vmatprep.subr.bf16.mxu1 %v5481_v29  ;;  %v5581_v29 = vld [vmem:[%s7697_s8 + $0x380] ss:$28 sps:$4 sm:$0xff]  }
 0x2f3   :  { %2388 = vmatpush1.bf16.msra.mxu1 %v5479_v30  ;;  %v5584_v30 = vld [vmem:[%s7697_s8 + $0x388] ss:$28 sps:$4 sm:$0xff]  }
 0x2f4   :  { %2389 = vmatprep.subr.bf16.mxu1 %v5484_v31  ;;  %v5589_v31 = vld [vmem:[%s7697_s8 + $0x3bc] ss:$28 sps:$4 sm:$0xff]  }
 0x2f7   :  { %2390 = vmatpush1.bf16.msra.mxu1 %v5482_v32  ;;  %v5592_v32 = vld [vmem:[%s7697_s8 + $0x3c4] ss:$28 sps:$4 sm:$0xff]  }
 0x2f8   :  { %3875 = vmatprep.subr.bf16.mxu1 %v5487_v33  ;;  %v5587_v33 = vld [vmem:[%s7697_s8 + $0x3b8] ss:$28 sps:$4 sm:$0xff]  }
 0x2fa   :  { %2408 = vmatmul.mubr.bf16.vlgmr.msra.gmra.mrb[8].mxu1 %v2117_v18 }
 0x2fb   :  { %3876 = vmatpush1.bf16.msra.mxu1 %v5485_v34  ;;  %v5590_v34 = vld [vmem:[%s7697_s8 + $0x3c0] ss:$28 sps:$4 sm:$0xff]  }
 0x2fc   :  { %3877 = vmatprep.subr.bf16.mxu1 %v5493_v35  ;;  %v5595_v35 = vld [vmem:[%s7697_s8 + $0x3f4] ss:$28 sps:$4 sm:$0xff]  }
 0x2ff   :  { %3878 = vmatpush1.bf16.msra.mxu1 %v5491_v36  ;;  %v5598_v36 = vld [vmem:[%s7697_s8 + $0x3fc] ss:$28 sps:$4 sm:$0xff]  }
 0x300   :  { %3879 = vmatprep.subr.bf16.mxu1 %v5499_v37  ;;  %v5593_v37 = vld [vmem:[%s7697_s8 + $0x3f0] ss:$28 sps:$4 sm:$0xff]  }
 0x303   :  { %3880 = vmatpush1.bf16.msra.mxu1 %v5497_v38  ;;  %v5596_v38 = vld [vmem:[%s7697_s8 + $0x3f8] ss:$28 sps:$4 sm:$0xff]  }
 0x304   :  { %3881 = vmatprep.subr.bf16.mxu1 %v5505_v39  ;;  %v5601_v39 = vld [vmem:[%s7697_s8 + $0x42c] ss:$28 sps:$4 sm:$0xff]  }
 0x307   :  { %3882 = vmatpush1.bf16.msra.mxu1 %v5503_v40  ;;  %v5604_v40 = vld [vmem:[%s7697_s8 + $0x434] ss:$28 sps:$4 sm:$0xff]  }
 0x308   :  { %3883 = vmatprep.subr.bf16.mxu1 %v5511_v41  ;;  %v5599_v41 = vld [vmem:[%s7697_s8 + $0x428] ss:$28 sps:$4 sm:$0xff]  }
 0x30b   :  { %3884 = vmatpush1.bf16.msra.mxu1 %v5509_v42  ;;  %v5602_v42 = vld [vmem:[%s7697_s8 + $0x430] ss:$28 sps:$4 sm:$0xff]  }
 0x30c   :  { %3885 = vmatprep.subr.bf16.mxu1 %v5517_v43  ;;  %v5607_v43 = vld [vmem:[%s7697_s8 + $0x464] ss:$28 sps:$4 sm:$0xff]  }
 0x30f   :  { %3886 = vmatpush1.bf16.msra.mxu1 %v5515_v44  ;;  %v5610_v44 = vld [vmem:[%s7697_s8 + $0x46c] ss:$28 sps:$4 sm:$0xff]  }
 0x310   :  { %3887 = vmatprep.subr.bf16.mxu1 %v5523_v45  ;;  %v5605_v45 = vld [vmem:[%s7697_s8 + $0x460] ss:$28 sps:$4 sm:$0xff]  }
 0x313   :  { %3888 = vmatpush1.bf16.msra.mxu1 %v5521_v46  ;;  %v5608_v46 = vld [vmem:[%s7697_s8 + $0x468] ss:$28 sps:$4 sm:$0xff]  }
 0x314   :  { %3889 = vmatprep.subr.bf16.mxu1 %v5529_v47  ;;  %v5613_v47 = vld [vmem:[%s7697_s8 + $0x49c] ss:$28 sps:$4 sm:$0xff]  }
 0x317   :  { %3890 = vmatpush1.bf16.msra.mxu1 %v5527_v48  ;;  %v5616_v48 = vld [vmem:[%s7697_s8 + $0x4a4] ss:$28 sps:$4 sm:$0xff]  }
 0x318   :  { %3891 = vmatprep.subr.bf16.mxu1 %v5535_v49  ;;  %v5611_v49 = vld [vmem:[%s7697_s8 + $0x498] ss:$28 sps:$4 sm:$0xff]  }
 0x31b   :  { %3892 = vmatpush1.bf16.msra.mxu1 %v5533_v50  ;;  %v5614_v50 = vld [vmem:[%s7697_s8 + $0x4a0] ss:$28 sps:$4 sm:$0xff]  }
 0x31c   :  { %3893 = vmatprep.subr.bf16.mxu1 %v5541_v51  ;;  %v2163_v51 = vrot.slane %v7138_v12, %v6730_v2 }
 0x31f   :  { %3894 = vmatpush1.bf16.msra.mxu1 %v5539_v52  ;;  %v5619_v52 = vld [vmem:[%s7697_s8 + $0x4d4] ss:$28 sps:$4 sm:$0xff]  }
 0x320   :  { %3895 = vmatprep.subr.bf16.mxu1 %v5547_v53  ;;  %v5622_v53 = vld [vmem:[%s7697_s8 + $0x4dc] ss:$28 sps:$4 sm:$0xff]  }
 0x323   :  { %3896 = vmatpush1.bf16.msra.mxu1 %v5545_v54  ;;  %v2167_v54 = vrot.slane %v7138_v12, %v6739_v5  ;;  %v5631_v12 = vld [vmem:[%s7697_s8 + $0x544] ss:$28 sps:$4 sm:$0xff]  }
 0x324   :  { %3897 = vmatprep.subr.bf16.mxu1 %v5553_v55 }
 0x327   :  { %3898 = vmatpush1.bf16.msra.mxu1 %v5551_v56  ;;  %v5617_v56 = vld [vmem:[%s7697_s8 + $0x4d0] ss:$28 sps:$4 sm:$0xff]  }
 0x328   :  { %3899 = vmatprep.subr.bf16.mxu1 %v5559_v57  ;;  %v5620_v57 = vld [vmem:[%s7697_s8 + $0x4d8] ss:$28 sps:$4 sm:$0xff]  }
 0x32b   :  { %3900 = vmatpush1.bf16.msra.mxu1 %v5557_v58 }
 0x32c   :  { %3901 = vmatprep.subr.bf16.mxu1 %v5565_v59 }
 0x32f   :  { %3902 = vmatpush1.bf16.msra.mxu1 %v5563_v60  ;;  %v5625_v60 = vld [vmem:[%s7697_s8 + $0x50c] ss:$28 sps:$4 sm:$0xff]  }
 0x330   :  { %3903 = vmatprep.subr.bf16.mxu1 %v5571_v61  ;;  %v5628_v61 = vld [vmem:[%s7697_s8 + $0x514] ss:$28 sps:$4 sm:$0xff]  }
 0x333   :  { %3904 = vmatpush1.bf16.msra.mxu1 %v5569_v63 }
 0x334   :  { %3905 = vmatprep.subr.bf16.mxu1 %v5577_v6 }
 0x337   :  { %3906 = vmatpush1.bf16.msra.mxu1 %v5575_v8  ;;  %v5623_v8 = vld [vmem:[%s7697_s8 + $0x508] ss:$28 sps:$4 sm:$0xff]  }
 0x338   :  { %3918 = vmatprep.subr.bf16.mxu1 %v5583_v10 }
 0x3ad   :  { %v2366_v15 = vpop.f32.mrb[4].mxu1 }
 0x3ae   :  { %v2367_v16 = vadd.f32 %v2366_v15, %v2155_v13  ;;  %v2368_v17 = vpop.f32.mrb[5].mxu1 }
 0x3af   :  { %v2369_v18 = vadd.f32 %v2368_v17, %v2159_v14  ;;  %v2370_v19 = vpop.f32.mrb[6].mxu1 }
 0x3b0   :  { %v2371_v20 = vadd.f32 %v2370_v19, %v2155_v13  ;;  %v2372_v21 = vpop.f32.mrb[7].mxu1  ;;  %v2418_v24 = vmax.f32 %v2367_v16, 0.0  ;;  %v5634_v13 = vld [vmem:[%s7697_s8 + $0x54c] ss:$28 sps:$4 sm:$0xff]  }
 0x3b1   :  { %v2373_v22 = vadd.f32 %v2372_v21, %v2159_v14  ;;  %v2419_v25 = vmax.f32 %v2369_v18, 0.0  ;;  %v5629_v18 = vld [vmem:[%s7697_s8 + $0x540] ss:$28 sps:$4 sm:$0xff]   ;;  %v5632_v19 = vld [vmem:[%s7697_s8 + $0x548] ss:$28 sps:$4 sm:$0xff]  }
 0x3b2   :  { %v2422_v23 = vmax.f32 %v2371_v20, 0.0  ;;  %v5637_v20 = vld [vmem:[%s7697_s8 + $0x57c] ss:$28 sps:$4 sm:$0xff]   ;;  %v5640_v21 = vld [vmem:[%s7697_s8 + $0x584] ss:$28 sps:$4 sm:$0xff]  }
 0x3b3   :  { %v2423_v26 = vmax.f32 %v2373_v22, 0.0  ;;  %v5635_v22 = vld [vmem:[%s7697_s8 + $0x578] ss:$28 sps:$4 sm:$0xff]  }
 0x3b4   :  { %v7144_v27 = vpack.c.bf16 %v2422_v23, %v2418_v24  ;;  %v5638_v24 = vld [vmem:[%s7697_s8 + $0x580] ss:$28 sps:$4 sm:$0xff]   ;;  %v5643_v23 = vld [vmem:[%s7697_s8 + $0x5b4] ss:$28 sps:$4 sm:$0xff]  }
 0x3b5   :  { %v7146_v28 = vpack.c.bf16 %v2423_v26, %v2419_v25  ;;  %v5646_v25 = vld [vmem:[%s7697_s8 + $0x5bc] ss:$28 sps:$4 sm:$0xff]   ;;  %v5641_v26 = vld [vmem:[%s7697_s8 + $0x5b0] ss:$28 sps:$4 sm:$0xff]  }
 0x3b7   :  { %3907 = vmatprep.mubr.bf16.mxu1 %v7146_v28  ;;  %3993 = vmatprep.mubr.bf16.mxu0 %v7146_v28 }
 0x3b8   :  { %3908 = vmatmul.mubr.bf16.vlgmr.msra.gmra.mrb[12].mxu1 %v7144_v27  ;;  %3994 = vmatmul.mubr.bf16.vlgmr.msra.gmra.mrb[8].mxu0 %v7144_v27 }
 0x3b9   :  { %3919 = vmatpush1.bf16.msra.mxu1 %v5581_v29  ;;  %4005 = vmatpush1.bf16.msra.mxu0 %v5584_v30  ;;  %v5644_v29 = vld [vmem:[%s7697_s8 + $0x5b8] ss:$28 sps:$4 sm:$0xff]   ;;  %v5649_v30 = vld [vmem:[%s7697_s8 + $0x5ec] ss:$28 sps:$4 sm:$0xff]  }
 0x3ba   :  { %3920 = vmatprep.subr.bf16.mxu1 %v5589_v31  ;;  %4006 = vmatprep.subr.bf16.mxu0 %v5592_v32  ;;  %v5652_v31 = vld [vmem:[%s7697_s8 + $0x5f4] ss:$28 sps:$4 sm:$0xff]   ;;  %v5647_v32 = vld [vmem:[%s7697_s8 + $0x5e8] ss:$28 sps:$4 sm:$0xff]  }
 0x3bd   :  { %3921 = vmatpush1.bf16.msra.mxu1 %v5587_v33  ;;  %4007 = vmatpush1.bf16.msra.mxu0 %v5590_v34  ;;  %v5650_v33 = vld [vmem:[%s7697_s8 + $0x5f0] ss:$28 sps:$4 sm:$0xff]   ;;  %v5655_v34 = vld [vmem:[%s7697_s8 + $0x624] ss:$28 sps:$4 sm:$0xff]  }
 0x3be   :  { %3922 = vmatprep.subr.bf16.mxu1 %v5595_v35  ;;  %4008 = vmatprep.subr.bf16.mxu0 %v5598_v36  ;;  %v5658_v35 = vld [vmem:[%s7697_s8 + $0x62c] ss:$28 sps:$4 sm:$0xff]   ;;  %v5653_v36 = vld [vmem:[%s7697_s8 + $0x620] ss:$28 sps:$4 sm:$0xff]  }
 0x3c1   :  { %3923 = vmatpush1.bf16.msra.mxu1 %v5593_v37  ;;  %4009 = vmatpush1.bf16.msra.mxu0 %v5596_v38  ;;  %v5656_v37 = vld [vmem:[%s7697_s8 + $0x628] ss:$28 sps:$4 sm:$0xff]   ;;  %v5661_v38 = vld [vmem:[%s7697_s8 + $0x65c] ss:$28 sps:$4 sm:$0xff]  }
 0x3c2   :  { %3924 = vmatprep.subr.bf16.mxu1 %v5601_v39  ;;  %4010 = vmatprep.subr.bf16.mxu0 %v5604_v40  ;;  %v5664_v39 = vld [vmem:[%s7697_s8 + $0x664] ss:$28 sps:$4 sm:$0xff]   ;;  %v5659_v40 = vld [vmem:[%s7697_s8 + $0x658] ss:$28 sps:$4 sm:$0xff]  }
 0x3c5   :  { %3925 = vmatpush1.bf16.msra.mxu1 %v5599_v41  ;;  %4011 = vmatpush1.bf16.msra.mxu0 %v5602_v42  ;;  %v5662_v41 = vld [vmem:[%s7697_s8 + $0x660] ss:$28 sps:$4 sm:$0xff]   ;;  %v5667_v42 = vld [vmem:[%s7697_s8 + $0x694] ss:$28 sps:$4 sm:$0xff]  }
 0x3c6   :  { %3926 = vmatprep.subr.bf16.mxu1 %v5607_v43  ;;  %4012 = vmatprep.subr.bf16.mxu0 %v5610_v44  ;;  %v5670_v43 = vld [vmem:[%s7697_s8 + $0x69c] ss:$28 sps:$4 sm:$0xff]   ;;  %v5665_v44 = vld [vmem:[%s7697_s8 + $0x690] ss:$28 sps:$4 sm:$0xff]  }
 0x3c9   :  { %3927 = vmatpush1.bf16.msra.mxu1 %v5605_v45  ;;  %4013 = vmatpush1.bf16.msra.mxu0 %v5608_v46  ;;  %v5668_v45 = vld [vmem:[%s7697_s8 + $0x698] ss:$28 sps:$4 sm:$0xff]   ;;  %v5673_v46 = vld [vmem:[%s7697_s8 + $0x6cc] ss:$28 sps:$4 sm:$0xff]  }
 0x3ca   :  { %3928 = vmatprep.subr.bf16.mxu1 %v5613_v47  ;;  %4014 = vmatprep.subr.bf16.mxu0 %v5616_v48  ;;  %v5676_v47 = vld [vmem:[%s7697_s8 + $0x6d4] ss:$28 sps:$4 sm:$0xff]   ;;  %v5671_v48 = vld [vmem:[%s7697_s8 + $0x6c8] ss:$28 sps:$4 sm:$0xff]  }
 0x3cd   :  { %v2409_v55 = vpop.f32.mrb[8].mxu1  ;;  %3929 = vmatpush1.bf16.msra.mxu1 %v5611_v49  ;;  %4015 = vmatpush1.bf16.msra.mxu0 %v5614_v50  ;;  %v5674_v49 = vld [vmem:[%s7697_s8 + $0x6d0] ss:$28 sps:$4 sm:$0xff]  }
 0x3ce   :  { %v2410_v58 = vadd.f32 %v2409_v55, %v2163_v51  ;;  %v2411_v59 = vpop.f32.mrb[9].mxu1  ;;  %3930 = vmatprep.subr.bf16.mxu1 %v5619_v52  ;;  %4016 = vmatprep.subr.bf16.mxu0 %v5622_v53  ;;  %v5679_v50 = vld [vmem:[%s7697_s8 + $0x14] ss:$28 sps:$4 sm:$0xff]  }
 0x3cf   :  { %v2412_v62 = vadd.f32 %v2411_v59, %v2167_v54  ;;  %v2413_v63 = vpop.f32.mrb[10].mxu1  ;;  %v5677_v52 = vld [vmem:[%s7697_s8 + $0x10] ss:$28 sps:$4 sm:$0xff]   ;;  %v5681_v53 = vld [vmem:[%s7697_s8 + $0x18] ss:$28 sps:$4 sm:$0xff]  }
 0x3d0   :  { %v2414_v3 = vadd.f32 %v2413_v63, %v2163_v51  ;;  %v2415_v6 = vpop.f32.mrb[11].mxu1  ;;  %v2420_v10 = vmax.f32 %v2410_v58, 0.0  ;;  %v5680_v51 = vld [vmem:[%s7697_s8 + $0x1d8] ss:$28 sps:$4 sm:$0xff]   ;;  %v5685_v55 = vld [vmem:[%s7697_s8 + $0x210] ss:$28 sps:$4 sm:$0xff]  }
 0x3d1   :  { %v2416_v7 = vadd.f32 %v2415_v6, %v2167_v54  ;;  %3931 = vmatpush1.bf16.msra.mxu1 %v5617_v56  ;;  %4017 = vmatpush1.bf16.msra.mxu0 %v5620_v57  ;;  %v2421_v14 = vmax.f32 %v2412_v62, 0.0  ;;  %v5684_v54 = vld [vmem:[%s7697_s8 + $0x4c] ss:$28 sps:$4 sm:$0xff]   ;;  %v5689_v58 = vld [vmem:[%s7697_s8 + $0x84] ss:$28 sps:$4 sm:$0xff]  }
 0x3d2   :  { %v2424_v11 = vmax.f32 %v2414_v3, 0.0  ;;  %3932 = vmatprep.subr.bf16.mxu1 %v5625_v60  ;;  %4018 = vmatprep.subr.bf16.mxu0 %v5628_v61  ;;  %v5682_v56 = vld [vmem:[%s7697_s8 + $0x48] ss:$28 sps:$4 sm:$0xff]   ;;  %v5686_v57 = vld [vmem:[%s7697_s8 + $0x50] ss:$28 sps:$4 sm:$0xff]  }
 0x3d3   :  { %v2425_v15 = vmax.f32 %v2416_v7, 0.0  ;;  %v5690_v59 = vld [vmem:[%s7697_s8 + $0x248] ss:$28 sps:$4 sm:$0xff]   ;;  %v5687_v60 = vld [vmem:[%s7697_s8 + $0x80] ss:$28 sps:$4 sm:$0xff]  }
 0x3d4   :  { %v7252_v16 = vpack.c.bf16 %v2424_v11, %v2420_v10  ;;  %v5694_v61 = vld [vmem:[%s7697_s8 + $0xbc] ss:$28 sps:$4 sm:$0xff]   ;;  %v5699_v6 = vld [vmem:[%s7697_s8 + $0xf4] ss:$28 sps:$4 sm:$0xff]   ;;  %v5704_v10 = vld [vmem:[%s7697_s8 + $0x12c] ss:$28 sps:$4 sm:$0xff]  }
 0x3d5   :  { %v7254_v17 = vpack.c.bf16 %v2425_v15, %v2421_v14  ;;  %3933 = vmatpush1.bf16.msra.mxu1 %v5623_v8  ;;  %4019 = vmatpush1.bf16.msra.mxu0 %v5626_v9  ;;  %v5695_v62 = vld [vmem:[%s7697_s8 + $0x280] ss:$28 sps:$4 sm:$0xff]   ;;  %v5692_v63 = vld [vmem:[%s7697_s8 + $0xb8] ss:$28 sps:$4 sm:$0xff]   ;;  %v5697_v8 = vld [vmem:[%s7697_s8 + $0xf0] ss:$28 sps:$4 sm:$0xff]  }
 0x3d6   :  { %3934 = vmatprep.subr.bf16.mxu1 %v5631_v12  ;;  %4020 = vmatprep.subr.bf16.mxu0 %v5634_v13  ;;  %v5696_v3 = vld [vmem:[%s7697_s8 + $0xc0] ss:$28 sps:$4 sm:$0xff]   ;;  %v5700_v7 = vld [vmem:[%s7697_s8 + $0x2b8] ss:$28 sps:$4 sm:$0xff]   ;;  %v5705_v11 = vld [vmem:[%s7697_s8 + $0x2f0] ss:$28 sps:$4 sm:$0xff]  }
 0x3d7   :  { %3950 = vmatprep.mubr.bf16.mxu1 %v7254_v17  ;;  %4036 = vmatprep.mubr.bf16.mxu0 %v7254_v17  ;;  %v5701_v9 = vld [vmem:[%s7697_s8 + $0xf8] ss:$28 sps:$4 sm:$0xff]   ;;  %v5702_v12 = vld [vmem:[%s7697_s8 + $0x128] ss:$28 sps:$4 sm:$0xff]   ;;  %v5706_v13 = vld [vmem:[%s7697_s8 + $0x130] ss:$28 sps:$4 sm:$0xff]  }
 0x3d8   :  { %v5709_v14 = vld [vmem:[%s7697_s8 + $0x164] ss:$28 sps:$4 sm:$0xff]  }
 0x3d9   :  { %3935 = vmatpush1.bf16.msra.mxu1 %v5629_v18  ;;  %4021 = vmatpush1.bf16.msra.mxu0 %v5632_v19  ;;  %v5710_v15 = vld [vmem:[%s7697_s8 + $0x328] ss:$28 sps:$4 sm:$0xff]   ;;  %v5707_v18 = vld [vmem:[%s7697_s8 + $0x160] ss:$28 sps:$4 sm:$0xff]  }
 0x3da   :  { %3936 = vmatprep.subr.bf16.mxu1 %v5637_v20  ;;  %4022 = vmatprep.subr.bf16.mxu0 %v5640_v21  ;;  %v5711_v19 = vld [vmem:[%s7697_s8 + $0x168] ss:$28 sps:$4 sm:$0xff]   ;;  %v5714_v20 = vld [vmem:[%s7697_s8 + $0x19c] ss:$28 sps:$4 sm:$0xff]  }
 0x3db   :  { %v5715_v21 = vld [vmem:[%s7697_s8 + $0x360] ss:$28 sps:$4 sm:$0xff]  }
 0x3dd   :  { %3937 = vmatpush1.bf16.msra.mxu1 %v5635_v22  ;;  %4023 = vmatpush1.bf16.msra.mxu0 %v5638_v24  ;;  %v5712_v22 = vld [vmem:[%s7697_s8 + $0x198] ss:$28 sps:$4 sm:$0xff]   ;;  %v5716_v24 = vld [vmem:[%s7697_s8 + $0x1a0] ss:$28 sps:$4 sm:$0xff]  }
 0x3de   :  { %3938 = vmatprep.subr.bf16.mxu1 %v5643_v23  ;;  %4024 = vmatprep.subr.bf16.mxu0 %v5646_v25  ;;  %v5719_v23 = vld [vmem:[%s7697_s8 + $0x1d4] ss:$28 sps:$4 sm:$0xff]  }
 0x3df   :  { %v5720_v25 = vld [vmem:[%s7697_s8 + $0x558] ss:$28 sps:$4 sm:$0xff]  }
 0x3e1   :  { %3939 = vmatpush1.bf16.msra.mxu1 %v5641_v26  ;;  %4025 = vmatpush1.bf16.msra.mxu0 %v5644_v29  ;;  %v5717_v26 = vld [vmem:[%s7697_s8 + $0x1d0] ss:$28 sps:$4 sm:$0xff]   ;;  %v5721_v29 = vld [vmem:[%s7697_s8 + $0x398] ss:$28 sps:$4 sm:$0xff]  }
 0x3e2   :  { %3940 = vmatprep.subr.bf16.mxu1 %v5649_v30  ;;  %4026 = vmatprep.subr.bf16.mxu0 %v5652_v31  ;;  %v5724_v30 = vld [vmem:[%s7697_s8 + $0x20c] ss:$28 sps:$4 sm:$0xff]  }
 0x3e3   :  { %v5725_v31 = vld [vmem:[%s7697_s8 + $0x590] ss:$28 sps:$4 sm:$0xff]  }
 0x3e5   :  { %3941 = vmatpush1.bf16.msra.mxu1 %v5647_v32  ;;  %4027 = vmatpush1.bf16.msra.mxu0 %v5650_v33  ;;  %v5722_v32 = vld [vmem:[%s7697_s8 + $0x208] ss:$28 sps:$4 sm:$0xff]   ;;  %v5726_v33 = vld [vmem:[%s7697_s8 + $0x3d0] ss:$28 sps:$4 sm:$0xff]  }
 0x3e6   :  { %3942 = vmatprep.subr.bf16.mxu1 %v5655_v34  ;;  %4028 = vmatprep.subr.bf16.mxu0 %v5658_v35  ;;  %v5729_v34 = vld [vmem:[%s7697_s8 + $0x244] ss:$28 sps:$4 sm:$0xff]  }
 0x3e7   :  { %v5730_v35 = vld [vmem:[%s7697_s8 + $0x5c8] ss:$28 sps:$4 sm:$0xff]  }
 0x3e9   :  { %3943 = vmatpush1.bf16.msra.mxu1 %v5653_v36  ;;  %4029 = vmatpush1.bf16.msra.mxu0 %v5656_v37  ;;  %v5727_v36 = vld [vmem:[%s7697_s8 + $0x240] ss:$28 sps:$4 sm:$0xff]   ;;  %v5731_v37 = vld [vmem:[%s7697_s8 + $0x408] ss:$28 sps:$4 sm:$0xff]  }
 0x3ea   :  { %3944 = vmatprep.subr.bf16.mxu1 %v5661_v38  ;;  %4030 = vmatprep.subr.bf16.mxu0 %v5664_v39  ;;  %v5734_v38 = vld [vmem:[%s7697_s8 + $0x27c] ss:$28 sps:$4 sm:$0xff]  }
 0x3eb   :  { %v5735_v39 = vld [vmem:[%s7697_s8 + $0x600] ss:$28 sps:$4 sm:$0xff]  }
 0x3ed   :  { %3945 = vmatpush1.bf16.msra.mxu1 %v5659_v40  ;;  %4031 = vmatpush1.bf16.msra.mxu0 %v5662_v41  ;;  %v5732_v40 = vld [vmem:[%s7697_s8 + $0x278] ss:$28 sps:$4 sm:$0xff]   ;;  %v5736_v41 = vld [vmem:[%s7697_s8 + $0x440] ss:$28 sps:$4 sm:$0xff]  }
 0x3ee   :  { %3946 = vmatprep.subr.bf16.mxu1 %v5667_v42  ;;  %4032 = vmatprep.subr.bf16.mxu0 %v5670_v43  ;;  %v5739_v42 = vld [vmem:[%s7697_s8 + $0x2b4] ss:$28 sps:$4 sm:$0xff]  }
 0x3ef   :  { %v5740_v43 = vld [vmem:[%s7697_s8 + $0x638] ss:$28 sps:$4 sm:$0xff]  }
 0x3f1   :  { %3947 = vmatpush1.bf16.msra.mxu1 %v5665_v44  ;;  %4033 = vmatpush1.bf16.msra.mxu0 %v5668_v45  ;;  %v5737_v44 = vld [vmem:[%s7697_s8 + $0x2b0] ss:$28 sps:$4 sm:$0xff]   ;;  %v5741_v45 = vld [vmem:[%s7697_s8 + $0x478] ss:$28 sps:$4 sm:$0xff]  }
 0x3f2   :  { %3948 = vmatprep.subr.bf16.mxu1 %v5673_v46  ;;  %4034 = vmatprep.subr.bf16.mxu0 %v5676_v47  ;;  %v5744_v46 = vld [vmem:[%s7697_s8 + $0x2ec] ss:$28 sps:$4 sm:$0xff]  }
 0x3f3   :  { %v5745_v47 = vld [vmem:[%s7697_s8 + $0x670] ss:$28 sps:$4 sm:$0xff]  }
 0x3f5   :  { %3949 = vmatpush1.bf16.msra.mxu1 %v5671_v48  ;;  %4035 = vmatpush1.bf16.msra.mxu0 %v5674_v49  ;;  %v5742_v48 = vld [vmem:[%s7697_s8 + $0x2e8] ss:$28 sps:$4 sm:$0xff]   ;;  %v5746_v49 = vld [vmem:[%s7697_s8 + $0x4b0] ss:$28 sps:$4 sm:$0xff]  }
 0x3f6   :  { %4047 = vmatprep.subr.bf16.mxu1 %v5679_v50  ;;  %4932 = vmatprep.subr.bf16.mxu0 %v5680_v51  ;;  %v5749_v50 = vld [vmem:[%s7697_s8 + $0x324] ss:$28 sps:$4 sm:$0xff]  }
 0x3f7   :  { %v5750_v51 = vld [vmem:[%s7697_s8 + $0x6a8] ss:$28 sps:$4 sm:$0xff]  }
 0x3f8   :  { %3951 = vmatmul.mubr.bf16.vlgmr.msra.gmra.mrb[12].mxu1 %v7252_v16  ;;  %4037 = vmatmul.mubr.bf16.vlgmr.msra.gmra.mrb[8].mxu0 %v7252_v16 }
 0x3f9   :  { %4048 = vmatpush1.bf16.msra.mxu1 %v5677_v52  ;;  %4079 = vmatprep.mubr.bf16.mxu1 %v7146_v28  ;;  %v5747_v52 = vld [vmem:[%s7697_s8 + $0x320] ss:$28 sps:$4 sm:$0xff]  }
 0x3fa   :  { %4933 = vmatpush3.bf16.msra.mxu0 %v5681_v53  ;;  %4165 = vmatprep.mubr.bf16.mxu0 %v7146_v28  ;;  %v5691_v28 = vld [vmem:[%s7697_s8 + $0x88] ss:$28 sps:$4 sm:$0xff]  }
 0x3fb   :  { %4049 = vmatprep.subr.bf16.mxu1 %v5684_v54  ;;  %4934 = vmatprep.subr.bf16.mxu0 %v5685_v55  ;;  %v5751_v53 = vld [vmem:[%s7697_s8 + $0x4e8] ss:$28 sps:$4 sm:$0xff]   ;;  %v5754_v54 = vld [vmem:[%s7697_s8 + $0x35c] ss:$28 sps:$4 sm:$0xff]  }
 0x3fc   :  { %v5755_v55 = vld [vmem:[%s7697_s8 + $0x6e0] ss:$28 sps:$4 sm:$0xff]  }
 0x3fd   :  { %4050 = vmatpush1.bf16.msra.mxu1 %v5682_v56  ;;  %v5752_v56 = vld [vmem:[%s7697_s8 + $0x358] ss:$28 sps:$4 sm:$0xff]  }
 0x3fe   :  { %4935 = vmatpush3.bf16.msra.mxu0 %v5686_v57  ;;  %4051 = vmatprep.subr.bf16.mxu1 %v5689_v58  ;;  %v5756_v57 = vld [vmem:[%s7697_s8 + $0x520] ss:$28 sps:$4 sm:$0xff]   ;;  %v5759_v58 = vld [vmem:[%s7697_s8 + $0x394] ss:$28 sps:$4 sm:$0xff]  }
 0x3ff   :  { %4936 = vmatprep.subr.bf16.mxu0 %v5690_v59  ;;  %v5757_v59 = vld [vmem:[%s7697_s8 + $0x390] ss:$28 sps:$4 sm:$0xff]  }
 0x401   :  { %4052 = vmatpush1.bf16.msra.mxu1 %v5687_v60  ;;  %v5762_v60 = vld [vmem:[%s7697_s8 + $0x3cc] ss:$28 sps:$4 sm:$0xff]  }
 0x402   :  { %4937 = vmatpush3.bf16.msra.mxu0 %v5691_v28  ;;  %4053 = vmatprep.subr.bf16.mxu1 %v5694_v61  ;;  %v5760_v28 = vld [vmem:[%s7697_s8 + $0x3c8] ss:$28 sps:$4 sm:$0xff]  }
 0x403   :  { %4938 = vmatprep.subr.bf16.mxu0 %v5695_v62  ;;  %v5765_v61 = vld [vmem:[%s7697_s8 + $0x404] ss:$28 sps:$4 sm:$0xff]  }
 0x404   :  { %v5763_v62 = vld [vmem:[%s7697_s8 + $0x400] ss:$28 sps:$4 sm:$0xff]  }
 0x405   :  { %4054 = vmatpush1.bf16.msra.mxu1 %v5692_v63  ;;  %v5771_v63 = vld [vmem:[%s7697_s8 + $0x474] ss:$28 sps:$4 sm:$0xff]  }
 0x406   :  { %4939 = vmatpush3.bf16.msra.mxu0 %v5696_v3  ;;  %4055 = vmatprep.subr.bf16.mxu1 %v5699_v6  ;;  %v5769_v3 = vld [vmem:[%s7697_s8 + $0x470] ss:$28 sps:$4 sm:$0xff]  }
 0x407   :  { %4940 = vmatprep.subr.bf16.mxu0 %v5700_v7  ;;  %v5774_v6 = vld [vmem:[%s7697_s8 + $0x4ac] ss:$28 sps:$4 sm:$0xff]  }
 0x408   :  { %v5772_v7 = vld [vmem:[%s7697_s8 + $0x4a8] ss:$28 sps:$4 sm:$0xff]  }
 0x409   :  { %4056 = vmatpush1.bf16.msra.mxu1 %v5697_v8  ;;  %v5777_v8 = vld [vmem:[%s7697_s8 + $0x4e4] ss:$28 sps:$4 sm:$0xff]  }
 0x40a   :  { %4941 = vmatpush3.bf16.msra.mxu0 %v5701_v9  ;;  %4057 = vmatprep.subr.bf16.mxu1 %v5704_v10  ;;  %v5775_v9 = vld [vmem:[%s7697_s8 + $0x4e0] ss:$28 sps:$4 sm:$0xff]  }
 0x40b   :  { %4942 = vmatprep.subr.bf16.mxu0 %v5705_v11  ;;  %v5780_v10 = vld [vmem:[%s7697_s8 + $0x51c] ss:$28 sps:$4 sm:$0xff]  }
 0x40c   :  { %v5778_v11 = vld [vmem:[%s7697_s8 + $0x518] ss:$28 sps:$4 sm:$0xff]  }
 0x40d   :  { %4058 = vmatpush1.bf16.msra.mxu1 %v5702_v12  ;;  %v5783_v12 = vld [vmem:[%s7697_s8 + $0x554] ss:$28 sps:$4 sm:$0xff]  }
 0x40e   :  { %4943 = vmatpush3.bf16.msra.mxu0 %v5706_v13  ;;  %4059 = vmatprep.subr.bf16.mxu1 %v5709_v14  ;;  %v5781_v13 = vld [vmem:[%s7697_s8 + $0x550] ss:$28 sps:$4 sm:$0xff]  }
 0x40f   :  { %4944 = vmatprep.subr.bf16.mxu0 %v5710_v15  ;;  %v5786_v14 = vld [vmem:[%s7697_s8 + $0x58c] ss:$28 sps:$4 sm:$0xff]  }
 0x410   :  { %v5784_v15 = vld [vmem:[%s7697_s8 + $0x588] ss:$28 sps:$4 sm:$0xff]  }
 0x411   :  { %4060 = vmatpush1.bf16.msra.mxu1 %v5707_v18  ;;  %v5789_v18 = vld [vmem:[%s7697_s8 + $0x5c4] ss:$28 sps:$4 sm:$0xff]  }
 0x412   :  { %4945 = vmatpush3.bf16.msra.mxu0 %v5711_v19  ;;  %4061 = vmatprep.subr.bf16.mxu1 %v5714_v20  ;;  %v5787_v19 = vld [vmem:[%s7697_s8 + $0x5c0] ss:$28 sps:$4 sm:$0xff]  }
 0x413   :  { %4946 = vmatprep.subr.bf16.mxu0 %v5715_v21  ;;  %v5792_v20 = vld [vmem:[%s7697_s8 + $0x5fc] ss:$28 sps:$4 sm:$0xff]  }
 0x414   :  { %v5790_v21 = vld [vmem:[%s7697_s8 + $0x5f8] ss:$28 sps:$4 sm:$0xff]  }
 0x415   :  { %4062 = vmatpush1.bf16.msra.mxu1 %v5712_v22  ;;  %v5795_v22 = vld [vmem:[%s7697_s8 + $0x634] ss:$28 sps:$4 sm:$0xff]  }
 0x416   :  { %4947 = vmatpush3.bf16.msra.mxu0 %v5716_v24  ;;  %4063 = vmatprep.subr.bf16.mxu1 %v5719_v23  ;;  %v5793_v24 = vld [vmem:[%s7697_s8 + $0x630] ss:$28 sps:$4 sm:$0xff]  }
 0x417   :  { %4954 = vmatprep.subr.bf16.mxu0 %v5720_v25  ;;  %v5798_v23 = vld [vmem:[%s7697_s8 + $0x66c] ss:$28 sps:$4 sm:$0xff]  }
 0x418   :  { %v5796_v25 = vld [vmem:[%s7697_s8 + $0x668] ss:$28 sps:$4 sm:$0xff]  }
 0x419   :  { %4166 = vmatmul.mubr.bf16.vlgmr.msra.gmra.mrb[12].mxu0 %v7144_v27  ;;  %4064 = vmatpush1.bf16.msra.mxu1 %v5717_v26  ;;  %v5801_v26 = vld [vmem:[%s7697_s8 + $0x6a4] ss:$28 sps:$4 sm:$0xff]  }
 0x41a   :  { %4955 = vmatpush3.bf16.msra.mxu0 %v5721_v29  ;;  %4206 = vmatprep.mubr.bf16.mxu0 %v7254_v17  ;;  %v5799_v29 = vld [vmem:[%s7697_s8 + $0x6a0] ss:$28 sps:$4 sm:$0xff]  }
 0x41b   :  { %4065 = vmatprep.subr.bf16.mxu1 %v5724_v30  ;;  %4956 = vmatprep.subr.bf16.mxu0 %v5725_v31  ;;  %v5804_v30 = vld [vmem:[%s7697_s8 + $0x6dc] ss:$28 sps:$4 sm:$0xff]  }
 0x41c   :  { %v5802_v31 = vld [vmem:[%s7697_s8 + $0x6d8] ss:$28 sps:$4 sm:$0xff]  }
 0x41d   :  { %4066 = vmatpush1.bf16.msra.mxu1 %v5722_v32  ;;  %v7649_v32 = vld [vmem:[%s7698_s9] sm:$0x7f] }
 0x41e   :  { %4957 = vmatpush3.bf16.msra.mxu0 %v5726_v33  ;;  %4067 = vmatprep.subr.bf16.mxu1 %v5729_v34  ;;  %v2691_v33 = vrot.slane %v7649_v32, %v6727_v1  ;;  %v2699_v34 = vrot.slane %v7649_v32, %v6730_v2 }
 0x41f   :  { %4958 = vmatprep.subr.bf16.mxu0 %v5730_v35  ;;  %v2695_v35 = vrot.slane %v7649_v32, %v6736_v4 }
 0x421   :  { %4068 = vmatpush1.bf16.msra.mxu1 %v5727_v36  ;;  %v2703_v36 = vrot.slane %v7649_v32, %v6739_v5 }
 0x422   :  { %4959 = vmatpush3.bf16.msra.mxu0 %v5731_v37  ;;  %4069 = vmatprep.subr.bf16.mxu1 %v5734_v38 }
 0x423   :  { %4960 = vmatprep.subr.bf16.mxu0 %v5735_v39 }
 0x425   :  { %4070 = vmatpush1.bf16.msra.mxu1 %v5732_v40 }
 0x426   :  { %4961 = vmatpush3.bf16.msra.mxu0 %v5736_v41  ;;  %4071 = vmatprep.subr.bf16.mxu1 %v5739_v42 }
 0x427   :  { %4962 = vmatprep.subr.bf16.mxu0 %v5740_v43 }
 0x429   :  { %4072 = vmatpush1.bf16.msra.mxu1 %v5737_v44 }
 0x42a   :  { %4963 = vmatpush3.bf16.msra.mxu0 %v5741_v45  ;;  %4073 = vmatprep.subr.bf16.mxu1 %v5744_v46 }
 0x42b   :  { %4964 = vmatprep.subr.bf16.mxu0 %v5745_v47 }
 0x42d   :  { %4074 = vmatpush1.bf16.msra.mxu1 %v5742_v48 }
 0x42e   :  { %4965 = vmatpush3.bf16.msra.mxu0 %v5746_v49  ;;  %4075 = vmatprep.subr.bf16.mxu1 %v5749_v50 }
 0x42f   :  { %4966 = vmatprep.subr.bf16.mxu0 %v5750_v51 }
 0x431   :  { %4076 = vmatpush1.bf16.msra.mxu1 %v5747_v52 }
 0x432   :  { %4967 = vmatpush3.bf16.msra.mxu0 %v5751_v53  ;;  %4077 = vmatprep.subr.bf16.mxu1 %v5754_v54 }
 0x433   :  { %4968 = vmatprep.subr.bf16.mxu0 %v5755_v55 }
 0x435   :  { %4078 = vmatpush1.bf16.msra.mxu1 %v5752_v56 }
 0x436   :  { %4969 = vmatpush3.bf16.msra.mxu0 %v5756_v57  ;;  %4090 = vmatprep.subr.bf16.mxu1 %v5759_v58 }
 0x438   :  { %4080 = vmatmul.mubr.bf16.vlgmr.msra.gmra.mrb[16].mxu1 %v7144_v27  ;;  %v5768_v27 = vld [vmem:[%s7697_s8 + $0x43c] ss:$28 sps:$4 sm:$0xff]  }
 0x439   :  { %4207 = vmatmul.mubr.bf16.vlgmr.msra.gmra.mrb[16].mxu0 %v7252_v16  ;;  %4091 = vmatpush1.bf16.msra.mxu1 %v5757_v59 }
 0x43a   :  { %4122 = vmatprep.mubr.bf16.mxu1 %v7254_v17  ;;  %4092 = vmatprep.subr.bf16.mxu1 %v5762_v60  ;;  %v5766_v17 = vld [vmem:[%s7697_s8 + $0x438] ss:$28 sps:$4 sm:$0xff]   ;;  %s5914_s8 = smov [#allocation4]  }
 0x43b   :  { %s4369_s9 = sshll.u32 %s5914_s8, 4  ;;  %s4370_s9 = int_to_ptr.vmem [resolvable:$true] %s4369_s9 }
 0x43c   :  { %s5865_s21 = scalar_lea.vmem %s4370_s9, 512  ;;  %p5870_p1 = scmp.lt.s32.totalorder %s4370_s9, %s4370_s9 }
 0x43d   :  { %4093 = vmatpush1.bf16.msra.mxu1 %v5760_v28  ;;  %p5866_p0 = scmp.ne.s32.totalorder %s4370_s9, %s5865_s21  ;;  %p5871_p2 = scmp.lt.s32.totalorder %s5865_s21, %s5865_s21 }
 0x43e   :  { %4094 = vmatprep.subr.bf16.mxu1 %v5765_v61 }
 0x43f   :  { %p5872_p3 = por %p5871_p2, %p5870_p1 }
 0x441   :  { %4095 = vmatpush1.bf16.msra.mxu1 %v5763_v62  ;;  %p5873_p4 = pnand %p5872_p3, %p5866_p0 }
 0x442   :  { %4096 = vmatprep.subr.bf16.mxu1 %v5768_v27 }
 0x445   :  { %4097 = vmatpush1.bf16.msra.mxu1 %v5766_v17 }
 0x446   :  { %4098 = vmatprep.subr.bf16.mxu1 %v5771_v63 }
 0x449   :  { %4099 = vmatpush1.bf16.msra.mxu1 %v5769_v3 }
 0x44a   :  { %4100 = vmatprep.subr.bf16.mxu1 %v5774_v6 }
 0x44d   :  { %4101 = vmatpush1.bf16.msra.mxu1 %v5772_v7 }
 0x44e   :  { %4102 = vmatprep.subr.bf16.mxu1 %v5777_v8 }
 0x451   :  { %4103 = vmatpush1.bf16.msra.mxu1 %v5775_v9 }
 0x452   :  { %4104 = vmatprep.subr.bf16.mxu1 %v5780_v10 }
 0x455   :  { %4105 = vmatpush1.bf16.msra.mxu1 %v5778_v11 }
 0x456   :  { %4106 = vmatprep.subr.bf16.mxu1 %v5783_v12 }
 0x459   :  { %4107 = vmatpush1.bf16.msra.mxu1 %v5781_v13 }
 0x45a   :  { %4108 = vmatprep.subr.bf16.mxu1 %v5786_v14 }
 0x45d   :  { %4109 = vmatpush1.bf16.msra.mxu1 %v5784_v15 }
 0x45e   :  { %4110 = vmatprep.subr.bf16.mxu1 %v5789_v18 }
 0x461   :  { %4111 = vmatpush1.bf16.msra.mxu1 %v5787_v19 }
 0x462   :  { %4112 = vmatprep.subr.bf16.mxu1 %v5792_v20 }
 0x465   :  { %4113 = vmatpush1.bf16.msra.mxu1 %v5790_v21 }
 0x466   :  { %4114 = vmatprep.subr.bf16.mxu1 %v5795_v22 }
 0x469   :  { %4115 = vmatpush1.bf16.msra.mxu1 %v5793_v24 }
 0x46a   :  { %4116 = vmatprep.subr.bf16.mxu1 %v5798_v23 }
 0x46d   :  { %4117 = vmatpush1.bf16.msra.mxu1 %v5796_v25 }
 0x46e   :  { %4118 = vmatprep.subr.bf16.mxu1 %v5801_v26 }
 0x471   :  { %4119 = vmatpush1.bf16.msra.mxu1 %v5799_v29 }
 0x472   :  { %4120 = vmatprep.subr.bf16.mxu1 %v5804_v30 }
 0x475   :  { %4121 = vmatpush1.bf16.msra.mxu1 %v5802_v31 }
 0x478   :  { %4123 = vmatmul.mubr.bf16.vlgmr.msra.gmra.mrb[16].mxu1 %v7252_v16 }
 0x4cb   :  { %v3952_v37 = vpop.f32.mrb[12].mxu1  ;;  %v4038_v38 = vpop.f32.mrb[8].mxu0 }
 0x4cc   :  { %v4988_v16 = vadd.f32 %v3952_v37, %v2691_v33  ;;  %v4992_v39 = vadd.f32 %v4038_v38, %v2699_v34  ;;  %v3954_v40 = vpop.f32.mrb[13].mxu1  ;;  %v4040_v41 = vpop.f32.mrb[9].mxu0 }
 0x4cd   :  { %v4989_v42 = vadd.f32 %v3954_v40, %v2695_v35  ;;  %v4993_v43 = vadd.f32 %v4040_v41, %v2703_v36  ;;  %v3956_v44 = vpop.f32.mrb[14].mxu1  ;;  %v4042_v45 = vpop.f32.mrb[10].mxu0 }
 0x4ce   :  { %v4902_v1 = vmul.f32 -1.442695, %v4988_v16  ;;  %v4904_v46 = vmul.f32 -1.442695, %v4992_v39  ;;  %v4990_v47 = vadd.f32 %v3956_v44, %v2691_v33  ;;  %v4994_v2 = vadd.f32 %v4042_v45, %v2699_v34  ;;  %v3958_v48 = vpop.f32.mrb[15].mxu1  ;;  %v4044_v49 = vpop.f32.mrb[11].mxu0 }
 0x4cf   :  { %v4903_v4 = vmul.f32 -1.442695, %v4989_v42  ;;  %v4905_v50 = vmul.f32 -1.442695, %v4993_v43  ;;  %v4991_v51 = vadd.f32 %v3958_v48, %v2695_v35  ;;  %v4995_v5 = vadd.f32 %v4044_v49, %v2703_v36 }
 0x4d0   :  { %5809 = vpow2.f32 %v4902_v1  ;;  %v4909_v52 = vmul.f32 -1.442695, %v4990_v47  ;;  %v4911_v53 = vmul.f32 -1.442695, %v4994_v2 }
 0x4d1   :  { %5811 = vpow2.f32 %v4904_v46  ;;  %v4910_v54 = vmul.f32 -1.442695, %v4991_v51  ;;  %v4912_v55 = vmul.f32 -1.442695, %v4995_v5 }
 0x4d2   :  { %5813 = vpow2.f32 %v4903_v4 }
 0x4d3   :  { %5815 = vpow2.f32 %v4905_v50 }
 0x4d4   :  { %5817 = vpow2.f32 %v4909_v52 }
 0x4d5   :  { %5819 = vpow2.f32 %v4911_v53 }
 0x4d6   :  { %5821 = vpow2.f32 %v4910_v54 }
 0x4d7   :  { %5823 = vpow2.f32 %v4912_v55 }
 0x4da   :  { %v5810_v56 = vpop.eup %5809 }
 0x4db   :  { %v5812_v57 = vpop.eup %5811  ;;  %v4257_v58 = vadd.f32 1.0, %v5810_v56 }
 0x4dc   :  { %v5814_v59 = vpop.eup %5813  ;;  %v4259_v60 = vadd.f32 1.0, %v5812_v57 }
 0x4dd   :  { %v5816_v28 = vpop.eup %5815  ;;  %5825 = vrcp.f32 %v4257_v58  ;;  %v4258_v61 = vadd.f32 1.0, %v5814_v59 }
 0x4de   :  { %v5818_v62 = vpop.eup %5817  ;;  %5827 = vrcp.f32 %v4259_v60  ;;  %v4260_v27 = vadd.f32 1.0, %v5816_v28 }
 0x4df   :  { %v5820_v17 = vpop.eup %5819  ;;  %5829 = vrcp.f32 %v4258_v61  ;;  %v4264_v63 = vadd.f32 1.0, %v5818_v62 }
 0x4e0   :  { %v5822_v3 = vpop.eup %5821  ;;  %5831 = vrcp.f32 %v4260_v27  ;;  %v4266_v6 = vadd.f32 1.0, %v5820_v17 }
 0x4e1   :  { %v5824_v7 = vpop.eup %5823  ;;  %5833 = vrcp.f32 %v4264_v63  ;;  %v4265_v8 = vadd.f32 1.0, %v5822_v3 }
 0x4e2   :  { %5835 = vrcp.f32 %v4266_v6  ;;  %v4267_v9 = vadd.f32 1.0, %v5824_v7 }
 0x4e3   :  { %5837 = vrcp.f32 %v4265_v8 }
 0x4e4   :  { %5839 = vrcp.f32 %v4267_v9 }
 0x4e7   :  { %v5826_v10 = vpop.eup %5825 }
 0x4e8   :  { %v5828_v11 = vpop.eup %5827 }
 0x4e9   :  { %v5830_v12 = vpop.eup %5829 }
 0x4ea   :  { %v5832_v13 = vpop.eup %5831  ;;  %v4924_v14 = vpack.c.bf16 %v5830_v12, %v5826_v10 }
 0x4eb   :  { %v5834_v15 = vpop.eup %5833  ;;  %v4925_v18 = vpack.c.bf16 %v5832_v13, %v5828_v11 }
 0x4ec   :  { %v5836_v19 = vpop.eup %5835  ;;  %4343 = vst [vmem:[#allocation2] sm:$0xff] %v4924_v14  ;;  %v4948_v20 = vpop.f32.mrb[12].mxu0 }
 0x4ed   :  { %v5838_v21 = vpop.eup %5837  ;;  %4344 = vst [vmem:[#allocation2 + $0x8] sm:$0xff] %v4925_v18  ;;  %v4949_v22 = vpop.f32.mrb[13].mxu0 }
 0x4ee   :  { %v5840_v24 = vpop.eup %5839  ;;  %v4928_v23 = vpack.c.bf16 %v5838_v21, %v5834_v15  ;;  %v4950_v25 = vadd.f32 %v4949_v22, %v4948_v20  ;;  %v4951_v26 = vpop.f32.mrb[14].mxu0 }
 0x4ef   :  { %v4929_v29 = vpack.c.bf16 %v5840_v24, %v5836_v19  ;;  %v4952_v30 = vpop.f32.mrb[15].mxu0 }
 0x4f0   :  { %4348 = vst [vmem:[#allocation2 + $0x1c] sm:$0xff] %v4928_v23  ;;  %v4953_v31 = vadd.f32 %v4952_v30, %v4951_v26 }
 0x4f1   :  { %4349 = vst [vmem:[#allocation2 + $0x24] sm:$0xff] %v4929_v29 }
 0x4f2   :  { %5876 = shalt.err (!%p5873_p4)
}
 0x4f3   :  { %s5877_s24 = scalar_lea.hbm %s7700_s11, 512 }
 0x4f4   :  { %p5878_p5 = scmp.ne.s32.totalorder %s7700_s11, %s5877_s24  ;;  %p5881_p6 = scmp.lt.u32.totalorder %s5877_s24, %s7700_s11 }
 0x4f6   :  { %p5883_p7 = pnand %p5881_p6, %p5878_p5 }
 0x4f8   :  { %5886 = shalt.err (!%p5883_p7)
}
 0x4f9   :  { %s5915_s1 = smov 256   ;;  %s5916_s0 = smov 16   ;;  %v2714_v33 = vsub.s32 6, %v6724_v0  ;;  %vm4346_vm1 = vcmask 125952   ;;  %v2706_v51 = vsub.s32 4, %v6724_v0  ;;  %v2710_v5 = vsub.s32 5, %v6724_v0 }
 0x4fa   :  { %4375 = dma.vmem_to_hbm [thread:$0]  %s4370_s9, 512, %s7700_s11, [#allocation5], %s5915_s1, %s5915_s1, %s5916_s0  }
 0x4fb   :  { %v2715_v34 = vrot.slane %v7649_v32, %v2714_v33  ;;  %v2707_v52 = vrot.slane %v7649_v32, %v2706_v51  ;;  %v2711_v53 = vrot.slane %v7649_v32, %v2710_v5  ;;  %s5917_s11 = smov [#allocation2]  }
 0x4fc   :  { %s4357_s3 = sshll.u32 %s5917_s11, 4  ;;  %s4358_s3 = int_to_ptr.vmem [resolvable:$true] %s4357_s3 }
 0x4fd   :  { %v4168_v37 = vadd.f32 %v4950_v25, %v2715_v34  ;;  %v4171_v40 = vadd.f32 %v4953_v31, %v2715_v34  ;;  %s5887_s30 = scalar_lea.vmem %s4358_s3, 896  ;;  %p5892_p9 = scmp.lt.s32.totalorder %s4358_s3, %s4358_s3 }
 0x4fe   :  { %p5888_p8 = scmp.ne.s32.totalorder %s4358_s3, %s5887_s30  ;;  %p5893_p10 = scmp.lt.s32.totalorder %s5887_s30, %s5887_s30 }
 0x500   :  { %p5894_p11 = por %p5893_p10, %p5892_p9 }
 0x502   :  { %p5895_p12 = pnand %p5894_p11, %p5888_p8 }
 0x50c   :  { %v4970_v35 = vpop.f32.mrb[16].mxu0 }
 0x50d   :  { %v4971_v36 = vpop.f32.mrb[17].mxu0 }
 0x50e   :  { %v4972_v38 = vadd.f32 %v4971_v36, %v4970_v35  ;;  %v4973_v16 = vpop.f32.mrb[18].mxu0 }
 0x50f   :  { %v4974_v39 = vpop.f32.mrb[19].mxu0 }
 0x510   :  { %v4209_v41 = vadd.f32 %v4972_v38, %v4168_v37  ;;  %v4975_v42 = vadd.f32 %v4974_v39, %v4973_v16 }
 0x512   :  { %v4908_v43 = vmul.f32 -1.442695, %v4209_v41  ;;  %v4212_v44 = vadd.f32 %v4975_v42, %v4171_v40 }
 0x514   :  { %5841 = vpow2.f32 %v4908_v43  ;;  %v4915_v45 = vmul.f32 -1.442695, %v4212_v44 }
 0x516   :  { %5843 = vpow2.f32 %v4915_v45 }
 0x51e   :  { %v5842_v1 = vpop.eup %5841 }
 0x51f   :  { %v4263_v46 = vadd.f32 1.0, %v5842_v1 }
 0x520   :  { %v5844_v47 = vpop.eup %5843 }
 0x521   :  { %5845 = vrcp.f32 %v4263_v46  ;;  %v4270_v2 = vadd.f32 1.0, %v5844_v47 }
 0x523   :  { %5847 = vrcp.f32 %v4270_v2 }
 0x52b   :  { %v5846_v48 = vpop.eup %5845 }
 0x52c   :  { %v4927_v49 = vpack.c.bf16 %v5846_v48, %v5846_v48 }
 0x52d   :  { %v5848_v4 = vpop.eup %5847 }
 0x52e   :  { %4347 = vst.msk [vmem:[#allocation2 + $0x18] sm:$0xf] %vm4346_vm1, %v4927_v49  ;;  %v4931_v50 = vpack.c.bf16 %v5848_v4, %v5848_v4 }
 0x530   :  { %4351 = vst.msk [vmem:[#allocation2 + $0x34] sm:$0xf] %vm4346_vm1, %v4931_v50 }
 0x54b   :  { %v4124_v54 = vpop.f32.mrb[16].mxu1 }
 0x54c   :  { %v4996_v55 = vadd.f32 %v4124_v54, %v2707_v52  ;;  %v4126_v56 = vpop.f32.mrb[17].mxu1 }
 0x54d   :  { %v4997_v57 = vadd.f32 %v4126_v56, %v2711_v53  ;;  %v4128_v58 = vpop.f32.mrb[18].mxu1 }
 0x54e   :  { %v4906_v59 = vmul.f32 -1.442695, %v4996_v55  ;;  %v4998_v60 = vadd.f32 %v4128_v58, %v2707_v52  ;;  %v4130_v28 = vpop.f32.mrb[19].mxu1 }
 0x54f   :  { %v4907_v61 = vmul.f32 -1.442695, %v4997_v57  ;;  %v4999_v62 = vadd.f32 %v4130_v28, %v2711_v53 }
 0x550   :  { %5849 = vpow2.f32 %v4906_v59  ;;  %v4913_v27 = vmul.f32 -1.442695, %v4998_v60 }
 0x551   :  { %5851 = vpow2.f32 %v4907_v61  ;;  %v4914_v17 = vmul.f32 -1.442695, %v4999_v62 }
 0x552   :  { %5853 = vpow2.f32 %v4913_v27 }
 0x553   :  { %5855 = vpow2.f32 %v4914_v17 }
 0x55a   :  { %v5850_v0 = vpop.eup %5849 }
 0x55b   :  { %v5852_v63 = vpop.eup %5851  ;;  %v4261_v3 = vadd.f32 1.0, %v5850_v0 }
 0x55c   :  { %v5854_v32 = vpop.eup %5853  ;;  %v4262_v6 = vadd.f32 1.0, %v5852_v63 }
 0x55d   :  { %v5856_v7 = vpop.eup %5855  ;;  %5857 = vrcp.f32 %v4261_v3  ;;  %v4268_v8 = vadd.f32 1.0, %v5854_v32 }
 0x55e   :  { %5859 = vrcp.f32 %v4262_v6  ;;  %v4269_v9 = vadd.f32 1.0, %v5856_v7 }
 0x55f   :  { %5861 = vrcp.f32 %v4268_v8 }
 0x560   :  { %5863 = vrcp.f32 %v4269_v9 }
 0x567   :  { %v5858_v10 = vpop.eup %5857 }
 0x568   :  { %v5860_v11 = vpop.eup %5859 }
 0x569   :  { %v5862_v12 = vpop.eup %5861  ;;  %v4926_v13 = vpack.c.bf16 %v5860_v11, %v5858_v10 }
 0x56a   :  { %v5864_v14 = vpop.eup %5863 }
 0x56b   :  { %4345 = vst [vmem:[#allocation2 + $0x10] sm:$0xff] %v4926_v13  ;;  %v4930_v15 = vpack.c.bf16 %v5864_v14, %v5862_v12 }
 0x56d   :  { %4350 = vst [vmem:[#allocation2 + $0x2c] sm:$0xff] %v4930_v15 }
 0x56e   :  { %5898 = shalt.err (!%p5895_p12)
}
 0x56f   :  { %s5899_s4 = scalar_lea.hbm %s7699_s10, 896 }
 0x570   :  { %p5900_p13 = scmp.ne.s32.totalorder %s7699_s10, %s5899_s4  ;;  %p5903_p0 = scmp.lt.u32.totalorder %s5899_s4, %s7699_s10 }
 0x572   :  { %p5905_p1 = pnand %p5903_p0, %p5900_p13 }
 0x574   :  { %5908 = shalt.err (!%p5905_p1)
}
 0x575   :  { %s5918_s17 = smov 448   ;;  %s5919_s2 = smov 28  }
 0x576   :  { %4363 = dma.vmem_to_hbm [thread:$0]  %s4358_s3, 896, %s7699_s10, [#allocation3], %s5918_s17, %s5918_s17, %s5919_s2  }
 0x577   :  { %5909 = dma.done.wait [#allocation3], 896  }
 0x578   :  { %5910 = vsyncadd [#allocation3], 4294966400 }
 0x579   :  { %5911 = dma.done.wait [#allocation5], 512  }
 0x57a   :  { %5912 = vsyncadd [#allocation5], 4294966784 }
 0x57b   :  { %4382 = vsyncpa [#allocation3], 1 }
 0x57c   :  { %4383 = vsyncpa [#allocation5], 1 }

</bundles_post_ra>
